<compile_context>
chip_gen: v5e
topology: v5e:2x2
jax: 0.10.0
libtpu: 0.0.40
codegen_flags: <defaults>
</compile_context>

<pallas_src>
import functools

import jax
import jax.numpy as jnp
from jax.experimental import pallas as pl
from jax.experimental.pallas import tpu as pltpu

EPS = 1e-5
LANES = 128


def _round_up(x, m):
    return (x + m - 1) // m * m


# ----------------------------------------------------------------------------
# Kernel A: fused [optional input BN+ReLU] -> 3x3 conv (stride 1, zero pad 1,
#           no bias) -> per-image BN batch statistics.  One grid step = image.
# ----------------------------------------------------------------------------
def _conv_bn_stats_kernel(x_ref, w_ref, scale_ref, bias_ref,      # inputs
                          y_ref, sum_ref, m2_ref,                 # outputs
                          pad_ref, acc_ref,                       # VMEM scratch
                          *, H, W, Cin, Cout, apply_input_act):
    # x_ref     : (1, H, W, Cin)   f32   un-padded input image
    # w_ref     : (3, 3*Cin, Cout)       packed conv weights (ky, kx*cin, cout)
    # scale_ref : (1, Cin)         f32   folded BN scale of the *input* (stage 2)
    # bias_ref  : (1, Cin)         f32   folded BN bias  of the *input* (stage 2)
    # y_ref     : (1, H*W, Cout)   f32   raw conv output (pre-BN)
    # sum_ref   : (1, 1, Cout)     f32   per-image channel sum of y
    # m2_ref    : (1, 1, Cout)     f32   per-image centered sum of squares of y
    # pad_ref   : (H+2, W+2, Cin)  f32   zero-bordered halo copy (VMEM scratch)
    # acc_ref   : (H*W, Cout)      f32   conv accumulator (VMEM scratch)
    x = x_ref[0]                                                  # (H, W, Cin)
    if apply_input_act:
        s = scale_ref[...].reshape(1, 1, Cin)
        b = bias_ref[...].reshape(1, 1, Cin)
        x = jnp.maximum(x * s + b, 0.0)     # previous stage's BN + ReLU, fused

    # Build the zero-padded (halo) copy entirely in VMEM: no HBM jnp.pad pass.
    pad_ref[...] = jnp.zeros_like(pad_ref)
    pad_ref[1:H + 1, 1:W + 1, :] = x

    acc_ref[...] = jnp.zeros_like(acc_ref)
    if Cin % LANES == 0:
        # Lane-aligned channels: pack the 3 width taps along K (K = 3*Cin),
        # one MXU dot per ky instead of 9 skinny dots.
        for ky in range(3):
            patch = jnp.concatenate(
                [pad_ref[ky:ky + H, kx:kx + W, :] for kx in range(3)], axis=-1,
            ).reshape(H * W, 3 * Cin).astype(w_ref.dtype)
            acc_ref[...] += jnp.dot(patch, w_ref[ky],
                                    preferred_element_type=jnp.float32)
    else:
        # Tiny Cin (e.g. the very first UNet layer): lane-packing would need a
        # non-aligned relayout, fall back to 9 taps with K = Cin.
        for ky in range(3):
            for kx in range(3):
                patch = pad_ref[ky:ky + H, kx:kx + W, :].reshape(
                    H * W, Cin).astype(w_ref.dtype)
                wk = w_ref[ky, kx * Cin:(kx + 1) * Cin, :]
                acc_ref[...] += jnp.dot(patch, wk,
                                        preferred_element_type=jnp.float32)

    y = acc_ref[...]                                              # (H*W, Cout)
    y_ref[0] = y
    # BN batch stats fused into the conv pass (no extra HBM read of y).
    # Per-image *centered* sum-of-squares avoids E[x^2]-E[x]^2 cancellation.
    s = jnp.sum(y, axis=0, keepdims=True)                         # (1, Cout)
    d = y - s * (1.0 / (H * W))
    sum_ref[0] = s
    m2_ref[0] = jnp.sum(d * d, axis=0, keepdims=True)


def conv_bn_stats(x_nhwc, w_packed, in_scale, in_bias, *, apply_input_act):
    N, H, W, Cin = x_nhwc.shape
    Cout = w_packed.shape[-1]
    kernel = functools.partial(_conv_bn_stats_kernel, H=H, W=W, Cin=Cin,
                               Cout=Cout, apply_input_act=apply_input_act)
    # TODO(synk): for UNet-scale H*W, row-tile the image (manual halo DMA or
    # Element-indexed windows) so blocks stay well inside v7x's 64 MiB VMEM and
    # the grid has many parallel steps; whole-image blocks are ample here.
    return pl.pallas_call(
        kernel,
        out_shape=(
            jax.ShapeDtypeStruct((N, H * W, Cout), jnp.float32),  # y (pre-BN)
            jax.ShapeDtypeStruct((N, 1, Cout), jnp.float32),      # per-image sum
            jax.ShapeDtypeStruct((N, 1, Cout), jnp.float32),      # per-image M2
        ),
        grid=(N,),
        in_specs=[
            pl.BlockSpec((1, H, W, Cin), lambda n: (n, 0, 0, 0)),
            pl.BlockSpec((3, w_packed.shape[1], Cout), lambda n: (0, 0, 0)),
            pl.BlockSpec((1, Cin), lambda n: (0, 0)),
            pl.BlockSpec((1, Cin), lambda n: (0, 0)),
        ],
        out_specs=(
            pl.BlockSpec((1, H * W, Cout), lambda n: (n, 0, 0)),
            pl.BlockSpec((1, 1, Cout), lambda n: (n, 0, 0)),
            pl.BlockSpec((1, 1, Cout), lambda n: (n, 0, 0)),
        ),
        scratch_shapes=[
            pltpu.VMEM((H + 2, W + 2, Cin), jnp.float32),   # halo buffer
            pltpu.VMEM((H * W, Cout), jnp.float32),         # conv accumulator
        ],
        # Stats are per-image partials (no cross-step accumulation), so the
        # image axis is safely "parallel" (megacore-shardable).
        compiler_params=pltpu.CompilerParams(dimension_semantics=("parallel",)),
    )(x_nhwc, w_packed, in_scale, in_bias)


# ----------------------------------------------------------------------------
# Kernel B: final folded-BN + ReLU for the second conv's output (lane-dense).
# ----------------------------------------------------------------------------
def _bn_relu_kernel(y_ref, scale_ref, bias_ref, o_ref):
    o_ref[0] = jnp.maximum(y_ref[0] * scale_ref[...] + bias_ref[...], 0.0)


def bn_relu(y, scale, bias):
    N, M, C = y.shape
    return pl.pallas_call(
        _bn_relu_kernel,
        out_shape=jax.ShapeDtypeStruct((N, M, C), jnp.float32),
        grid=(N,),
        in_specs=[
            pl.BlockSpec((1, M, C), lambda n: (n, 0, 0)),
            pl.BlockSpec((1, C), lambda n: (0, 0)),
            pl.BlockSpec((1, C), lambda n: (0, 0)),
        ],
        out_specs=pl.BlockSpec((1, M, C), lambda n: (n, 0, 0)),
        compiler_params=pltpu.CompilerParams(dimension_semantics=("parallel",)),
    )(y, scale, bias)


# ----------------------------------------------------------------------------
# Wrapper-side helpers (tiny (1, C)-sized math; stays in plain JAX).
# ----------------------------------------------------------------------------
def _fold_bn(sums, m2s, pixels_per_image, gamma_p, beta_p):
    """Fold train-mode BatchNorm into (scale, bias) from per-image partials."""
    n_img = sums.shape[0]
    total = n_img * pixels_per_image
    mean_i = sums[:, 0, :] / pixels_per_image                     # (N, C)
    mean = jnp.sum(sums[:, 0, :], axis=0, keepdims=True) / total  # (1, C)
    # Chan et al. parallel combination of per-image centered statistics.
    m2 = (jnp.sum(m2s[:, 0, :], axis=0, keepdims=True)
          + pixels_per_image * jnp.sum((mean_i - mean) ** 2, axis=0,
                                       keepdims=True))
    var = m2 / total                     # biased, like PyTorch BN normalization
    scale = gamma_p.reshape(1, -1) * jax.lax.rsqrt(var + EPS)
    bias = beta_p.reshape(1, -1) - mean * scale
    return scale, bias


def _pack_weight(w, cp_in, cp_out, dtype):
    # PyTorch (Cout, Cin, 3, 3) -> (3, 3*cp_in, cp_out), zero-padded channels,
    # K laid out as (kx-major, cin-minor) to match the in-kernel tap packing.
    cout, cin = w.shape[0], w.shape[1]
    wt = jnp.transpose(w, (2, 3, 1, 0)).astype(jnp.float32)       # (3,3,Cin,Cout)
    wt = jnp.pad(wt, ((0, 0), (0, 0), (0, cp_in - cin), (0, cp_out - cout)))
    return wt.reshape(3, 3 * cp_in, cp_out).astype(dtype)


def _pad_vec(v, cp):
    return jnp.pad(v.astype(jnp.float32), (0, cp - v.shape[0]))


# ----------------------------------------------------------------------------
# DoubleConv forward: NCHW in / NCHW out, PyTorch training-mode BatchNorm.
# ----------------------------------------------------------------------------
def double_conv(x_nchw, params, mxu_dtype=jnp.bfloat16):
    """mxu_dtype: dtype of the conv MXU operands (weights + im2col patches).
    bf16 doubles MXU throughput on v6e/v7x and halves weight bytes; all
    accumulation, BN statistics and elementwise math stay in f32 (v5e-safe)."""
    w1, g1, b1, w2, g2, b2 = params
    N, Cin, H, W = x_nchw.shape
    Cout = w1.shape[0]
    CP = _round_up(Cout, LANES)                    # lane-dense channel padding

    x = jnp.transpose(x_nchw, (0, 2, 3, 1)).astype(jnp.float32)   # -> NHWC

    w1p = _pack_weight(w1, Cin, CP, mxu_dtype)     # (3, 3*Cin, CP)
    w2p = _pack_weight(w2, CP, CP, mxu_dtype)      # (3, 3*CP,  CP)
    g1p, b1p = _pad_vec(g1, CP), _pad_vec(b1, CP)
    g2p, b2p = _pad_vec(g2, CP), _pad_vec(b2, CP)

    # Stage 1: conv1 + fused batch stats (raw input, no input activation).
    one = jnp.ones((1, Cin), jnp.float32)
    zero = jnp.zeros((1, Cin), jnp.float32)
    y1, s1, m21 = conv_bn_stats(x, w1p, one, zero, apply_input_act=False)
    scale1, bias1 = _fold_bn(s1, m21, H * W, g1p, b1p)

    # Stage 2: BN1 + ReLU folded into the input read of conv2, + fused stats.
    y2, s2, m22 = conv_bn_stats(y1.reshape(N, H, W, CP), w2p, scale1, bias1,
                                apply_input_act=True)
    scale2, bias2 = _fold_bn(s2, m22, H * W, g2p, b2p)

    # Final BN2 + ReLU elementwise pass (the only remaining extra HBM pass).
    out = bn_relu(y2, scale2, bias2)                        # (N, H*W, CP)
    out = out.reshape(N, H, W, CP)[..., :Cout]              # drop padded chans
    return jnp.transpose(out, (0, 3, 1, 2))                 # -> NCHW


# ----------------------------------------------------------------------------
# Pure-JAX reference (mirrors PyTorch semantics) for verification.
# ----------------------------------------------------------------------------
def ref_double_conv(x_nchw, params):
    w1, g1, b1, w2, g2, b2 = params

    def conv(x, w):
        return jax.lax.conv_general_dilated(
            x, w, window_strides=(1, 1), padding="SAME",
            dimension_numbers=("NCHW", "OIHW", "NCHW"))

    def bn_relu_ref(x, g, b):
        mean = x.mean(axis=(0, 2, 3), keepdims=True)
        var = x.var(axis=(0, 2, 3), keepdims=True)   # biased, like PyTorch norm
        y = (x - mean) / jnp.sqrt(var + EPS)
        y = y * g.reshape(1, -1, 1, 1) + b.reshape(1, -1, 1, 1)
        return jnp.maximum(y, 0.0)

    a = bn_relu_ref(conv(x_nchw, w1), g1, b1)
    return bn_relu_ref(conv(a, w2), g2, b2)


if __name__ == "__main__":
    N, Cin, Cout, H, W = 2, 4, 8, 16, 16

    key = jax.random.PRNGKey(0)
    k1, k2, k3, k4, k5, k6, kx = jax.random.split(key, 7)
    # Deterministic synthetic parameters (shapes from nn.Conv2d / nn.BatchNorm2d).
    w1 = 0.1 * jax.random.normal(k1, (Cout, Cin, 3, 3), jnp.float32)
    g1 = 1.0 + 0.1 * jax.random.normal(k2, (Cout,), jnp.float32)
    b1 = 0.1 * jax.random.normal(k3, (Cout,), jnp.float32)
    w2 = 0.1 * jax.random.normal(k4, (Cout, Cout, 3, 3), jnp.float32)
    g2 = 1.0 + 0.1 * jax.random.normal(k5, (Cout,), jnp.float32)
    b2 = 0.1 * jax.random.normal(k6, (Cout,), jnp.float32)
    params = (w1, g1, b1, w2, g2, b2)

    x = jax.random.normal(kx, (N, Cin, H, W), jnp.float32)

    ref = jax.block_until_ready(ref_double_conv(x, params))

    # f32 MXU operands: tight numerical check against the XLA reference.
    out_f32 = jax.block_until_ready(double_conv(x, params, mxu_dtype=jnp.float32))
    assert out_f32.shape == (N, Cout, H, W), out_f32.shape
    assert jnp.allclose(out_f32, ref, rtol=1e-3, atol=1e-3), \
        float(jnp.abs(out_f32 - ref).max())

    # bf16 MXU operands (fast path on v6e/v7x; f32 accumulation): looser check.
    out_bf16 = jax.block_until_ready(double_conv(x, params, mxu_dtype=jnp.bfloat16))
    assert jnp.allclose(out_bf16, ref, rtol=5e-2, atol=5e-2), \
        float(jnp.abs(out_bf16 - ref).max())

    print("KERNEL_OK")
</pallas_src>

<mosaic_0001>
module attributes {stable_mosaic.version = 11 : i64} {
  func.func @_conv_bn_stats_kernel(%arg0: i32, %arg1: memref<1x16x16x4xf32, #tpu.memory_space<vmem>>, %arg2: memref<3x12x128xf32, #tpu.memory_space<vmem>>, %arg3: memref<1x4xf32, #tpu.memory_space<vmem>>, %arg4: memref<1x4xf32, #tpu.memory_space<vmem>>, %arg5: memref<1x256x128xf32, #tpu.memory_space<vmem>>, %arg6: memref<1x1x128xf32, #tpu.memory_space<vmem>>, %arg7: memref<1x1x128xf32, #tpu.memory_space<vmem>>, %arg8: memref<18x18x4xf32, #tpu.memory_space<vmem>>, %arg9: memref<256x128xf32, #tpu.memory_space<vmem>>) attributes {dimension_semantics = [#tpu.dimension_semantics<parallel>], iteration_bounds = array<i64: 2>, scalar_prefetch = 0 : i64, scratch_operands = 2 : i64, tpu.core_type = #tpu.core_type<tc>, window_params = [{transform_indices = @transform_0, window_bounds = array<i64: 1, 16, 16, 4>}, {pipeline_mode = #tpu.pipeline_mode<synchronous>, transform_indices = @transform_1, window_bounds = array<i64: 3, 12, 128>}, {pipeline_mode = #tpu.pipeline_mode<synchronous>, transform_indices = @transform_2, window_bounds = array<i64: 1, 4>}, {pipeline_mode = #tpu.pipeline_mode<synchronous>, transform_indices = @transform_3, window_bounds = array<i64: 1, 4>}, {transform_indices = @transform_4, window_bounds = array<i64: 1, 256, 128>}, {transform_indices = @transform_5, window_bounds = array<i64: 1, 1, 128>}, {transform_indices = @transform_6, window_bounds = array<i64: 1, 1, 128>}]} {
    %c0 = arith.constant 0 : index
    %c0_0 = arith.constant 0 : index
    %c0_1 = arith.constant 0 : index
    %c0_2 = arith.constant 0 : index
    %0 = vector.load %arg1[%c0, %c0_0, %c0_1, %c0_2] : memref<1x16x16x4xf32, #tpu.memory_space<vmem>>, vector<1x16x16x4xf32>
    %1 = vector.shape_cast %0 : vector<1x16x16x4xf32> to vector<16x16x4xf32>
    %cst = arith.constant 0.000000e+00 : f32
    %2 = vector.broadcast %cst : f32 to vector<18x18x4xf32>
    %c0_3 = arith.constant 0 : index
    %c0_4 = arith.constant 0 : index
    %c0_5 = arith.constant 0 : index
    %3 = vector.load %arg8[%c0_3, %c0_4, %c0_5] : memref<18x18x4xf32, #tpu.memory_space<vmem>>, vector<18x18x4xf32>
    tpu.vector_store %arg8[%c0_3, %c0_4, %c0_5], %2 {strides = array<i32>} : memref<18x18x4xf32, #tpu.memory_space<vmem>>, vector<18x18x4xf32>,
    %c1 = arith.constant 1 : index
    %c1_6 = arith.constant 1 : index
    %c0_7 = arith.constant 0 : index
    %4 = vector.load %arg8[%c1, %c1_6, %c0_7] : memref<18x18x4xf32, #tpu.memory_space<vmem>>, vector<16x16x4xf32>
    tpu.vector_store %arg8[%c1, %c1_6, %c0_7], %1 {strides = array<i32>} : memref<18x18x4xf32, #tpu.memory_space<vmem>>, vector<16x16x4xf32>,
    %cst_8 = arith.constant 0.000000e+00 : f32
    %5 = vector.broadcast %cst_8 : f32 to vector<256x128xf32>
    %c0_9 = arith.constant 0 : index
    %c0_10 = arith.constant 0 : index
    %6 = vector.load %arg9[%c0_9, %c0_10] : memref<256x128xf32, #tpu.memory_space<vmem>>, vector<256x128xf32>
    tpu.vector_store %arg9[%c0_9, %c0_10], %5 {strides = array<i32>} : memref<256x128xf32, #tpu.memory_space<vmem>>, vector<256x128xf32>,
    %c0_11 = arith.constant 0 : index
    %c0_12 = arith.constant 0 : index
    %c0_13 = arith.constant 0 : index
    %7 = vector.load %arg8[%c0_11, %c0_12, %c0_13] : memref<18x18x4xf32, #tpu.memory_space<vmem>>, vector<16x16x4xf32>
    %8 = vector.shape_cast %7 : vector<16x16x4xf32> to vector<256x4xf32>
    %c0_14 = arith.constant 0 : index
    %c0_15 = arith.constant 0 : index
    %c0_16 = arith.constant 0 : index
    %9 = vector.load %arg2[%c0_14, %c0_15, %c0_16] : memref<3x12x128xf32, #tpu.memory_space<vmem>>, vector<1x4x128xf32>
    %10 = vector.shape_cast %9 : vector<1x4x128xf32> to vector<4x128xf32>
    %c0_17 = arith.constant 0 : index
    %c0_18 = arith.constant 0 : index
    %11 = vector.load %arg9[%c0_17, %c0_18] : memref<256x128xf32, #tpu.memory_space<vmem>>, vector<256x128xf32>
    %cst_19 = arith.constant dense<0.000000e+00> : vector<256x128xf32>
    %12 = tpu.matmul %8, %10, %cst_19 {dimension_numbers = #tpu.dot_dimension_numbers<[1], [0], [0], [1], [0, 0, 1, 1], [], []>} : vector<256x4xf32>, vector<4x128xf32>, vector<256x128xf32> -> vector<256x128xf32>
    %13 = arith.addf %11, %12 : vector<256x128xf32>
    %c0_20 = arith.constant 0 : index
    %c0_21 = arith.constant 0 : index
    %14 = vector.load %arg9[%c0_20, %c0_21] : memref<256x128xf32, #tpu.memory_space<vmem>>, vector<256x128xf32>
    tpu.vector_store %arg9[%c0_20, %c0_21], %13 {strides = array<i32>} : memref<256x128xf32, #tpu.memory_space<vmem>>, vector<256x128xf32>,
    %c0_22 = arith.constant 0 : index
    %c1_23 = arith.constant 1 : index
    %c0_24 = arith.constant 0 : index
    %15 = vector.load %arg8[%c0_22, %c1_23, %c0_24] : memref<18x18x4xf32, #tpu.memory_space<vmem>>, vector<16x16x4xf32>
    %16 = vector.shape_cast %15 : vector<16x16x4xf32> to vector<256x4xf32>
    %c0_25 = arith.constant 0 : index
    %c4 = arith.constant 4 : index
    %c0_26 = arith.constant 0 : index
    %17 = vector.load %arg2[%c0_25, %c4, %c0_26] : memref<3x12x128xf32, #tpu.memory_space<vmem>>, vector<1x4x128xf32>
    %18 = vector.shape_cast %17 : vector<1x4x128xf32> to vector<4x128xf32>
    %c0_27 = arith.constant 0 : index
    %c0_28 = arith.constant 0 : index
    %19 = vector.load %arg9[%c0_27, %c0_28] : memref<256x128xf32, #tpu.memory_space<vmem>>, vector<256x128xf32>
    %cst_29 = arith.constant dense<0.000000e+00> : vector<256x128xf32>
    %20 = tpu.matmul %16, %18, %cst_29 {dimension_numbers = #tpu.dot_dimension_numbers<[1], [0], [0], [1], [0, 0, 1, 1], [], []>} : vector<256x4xf32>, vector<4x128xf32>, vector<256x128xf32> -> vector<256x128xf32>
    %21 = arith.addf %19, %20 : vector<256x128xf32>
    %c0_30 = arith.constant 0 : index
    %c0_31 = arith.constant 0 : index
    %22 = vector.load %arg9[%c0_30, %c0_31] : memref<256x128xf32, #tpu.memory_space<vmem>>, vector<256x128xf32>
    tpu.vector_store %arg9[%c0_30, %c0_31], %21 {strides = array<i32>} : memref<256x128xf32, #tpu.memory_space<vmem>>, vector<256x128xf32>,
    %c0_32 = arith.constant 0 : index
    %c2 = arith.constant 2 : index
    %c0_33 = arith.constant 0 : index
    %23 = vector.load %arg8[%c0_32, %c2, %c0_33] : memref<18x18x4xf32, #tpu.memory_space<vmem>>, vector<16x16x4xf32>
    %24 = vector.shape_cast %23 : vector<16x16x4xf32> to vector<256x4xf32>
    %c0_34 = arith.constant 0 : index
    %c8 = arith.constant 8 : index
    %c0_35 = arith.constant 0 : index
    %25 = vector.load %arg2[%c0_34, %c8, %c0_35] : memref<3x12x128xf32, #tpu.memory_space<vmem>>, vector<1x4x128xf32>
    %26 = vector.shape_cast %25 : vector<1x4x128xf32> to vector<4x128xf32>
    %c0_36 = arith.constant 0 : index
    %c0_37 = arith.constant 0 : index
    %27 = vector.load %arg9[%c0_36, %c0_37] : memref<256x128xf32, #tpu.memory_space<vmem>>, vector<256x128xf32>
    %cst_38 = arith.constant dense<0.000000e+00> : vector<256x128xf32>
    %28 = tpu.matmul %24, %26, %cst_38 {dimension_numbers = #tpu.dot_dimension_numbers<[1], [0], [0], [1], [0, 0, 1, 1], [], []>} : vector<256x4xf32>, vector<4x128xf32>, vector<256x128xf32> -> vector<256x128xf32>
    %29 = arith.addf %27, %28 : vector<256x128xf32>
    %c0_39 = arith.constant 0 : index
    %c0_40 = arith.constant 0 : index
    %30 = vector.load %arg9[%c0_39, %c0_40] : memref<256x128xf32, #tpu.memory_space<vmem>>, vector<256x128xf32>
    tpu.vector_store %arg9[%c0_39, %c0_40], %29 {strides = array<i32>} : memref<256x128xf32, #tpu.memory_space<vmem>>, vector<256x128xf32>,
    %c1_41 = arith.constant 1 : index
    %c0_42 = arith.constant 0 : index
    %c0_43 = arith.constant 0 : index
    %31 = vector.load %arg8[%c1_41, %c0_42, %c0_43] : memref<18x18x4xf32, #tpu.memory_space<vmem>>, vector<16x16x4xf32>
    %32 = vector.shape_cast %31 : vector<16x16x4xf32> to vector<256x4xf32>
    %c1_44 = arith.constant 1 : index
    %c0_45 = arith.constant 0 : index
    %c0_46 = arith.constant 0 : index
    %33 = vector.load %arg2[%c1_44, %c0_45, %c0_46] : memref<3x12x128xf32, #tpu.memory_space<vmem>>, vector<1x4x128xf32>
    %34 = vector.shape_cast %33 : vector<1x4x128xf32> to vector<4x128xf32>
    %c0_47 = arith.constant 0 : index
    %c0_48 = arith.constant 0 : index
    %35 = vector.load %arg9[%c0_47, %c0_48] : memref<256x128xf32, #tpu.memory_space<vmem>>, vector<256x128xf32>
    %cst_49 = arith.constant dense<0.000000e+00> : vector<256x128xf32>
    %36 = tpu.matmul %32, %34, %cst_49 {dimension_numbers = #tpu.dot_dimension_numbers<[1], [0], [0], [1], [0, 0, 1, 1], [], []>} : vector<256x4xf32>, vector<4x128xf32>, vector<256x128xf32> -> vector<256x128xf32>
    %37 = arith.addf %35, %36 : vector<256x128xf32>
    %c0_50 = arith.constant 0 : index
    %c0_51 = arith.constant 0 : index
    %38 = vector.load %arg9[%c0_50, %c0_51] : memref<256x128xf32, #tpu.memory_space<vmem>>, vector<256x128xf32>
    tpu.vector_store %arg9[%c0_50, %c0_51], %37 {strides = array<i32>} : memref<256x128xf32, #tpu.memory_space<vmem>>, vector<256x128xf32>,
    %c1_52 = arith.constant 1 : index
    %c1_53 = arith.constant 1 : index
    %c0_54 = arith.constant 0 : index
    %39 = vector.load %arg8[%c1_52, %c1_53, %c0_54] : memref<18x18x4xf32, #tpu.memory_space<vmem>>, vector<16x16x4xf32>
    %40 = vector.shape_cast %39 : vector<16x16x4xf32> to vector<256x4xf32>
    %c1_55 = arith.constant 1 : index
    %c4_56 = arith.constant 4 : index
    %c0_57 = arith.constant 0 : index
    %41 = vector.load %arg2[%c1_55, %c4_56, %c0_57] : memref<3x12x128xf32, #tpu.memory_space<vmem>>, vector<1x4x128xf32>
    %42 = vector.shape_cast %41 : vector<1x4x128xf32> to vector<4x128xf32>
    %c0_58 = arith.constant 0 : index
    %c0_59 = arith.constant 0 : index
    %43 = vector.load %arg9[%c0_58, %c0_59] : memref<256x128xf32, #tpu.memory_space<vmem>>, vector<256x128xf32>
    %cst_60 = arith.constant dense<0.000000e+00> : vector<256x128xf32>
    %44 = tpu.matmul %40, %42, %cst_60 {dimension_numbers = #tpu.dot_dimension_numbers<[1], [0], [0], [1], [0, 0, 1, 1], [], []>} : vector<256x4xf32>, vector<4x128xf32>, vector<256x128xf32> -> vector<256x128xf32>
    %45 = arith.addf %43, %44 : vector<256x128xf32>
    %c0_61 = arith.constant 0 : index
    %c0_62 = arith.constant 0 : index
    %46 = vector.load %arg9[%c0_61, %c0_62] : memref<256x128xf32, #tpu.memory_space<vmem>>, vector<256x128xf32>
    tpu.vector_store %arg9[%c0_61, %c0_62], %45 {strides = array<i32>} : memref<256x128xf32, #tpu.memory_space<vmem>>, vector<256x128xf32>,
    %c1_63 = arith.constant 1 : index
    %c2_64 = arith.constant 2 : index
    %c0_65 = arith.constant 0 : index
    %47 = vector.load %arg8[%c1_63, %c2_64, %c0_65] : memref<18x18x4xf32, #tpu.memory_space<vmem>>, vector<16x16x4xf32>
    %48 = vector.shape_cast %47 : vector<16x16x4xf32> to vector<256x4xf32>
    %c1_66 = arith.constant 1 : index
    %c8_67 = arith.constant 8 : index
    %c0_68 = arith.constant 0 : index
    %49 = vector.load %arg2[%c1_66, %c8_67, %c0_68] : memref<3x12x128xf32, #tpu.memory_space<vmem>>, vector<1x4x128xf32>
    %50 = vector.shape_cast %49 : vector<1x4x128xf32> to vector<4x128xf32>
    %c0_69 = arith.constant 0 : index
    %c0_70 = arith.constant 0 : index
    %51 = vector.load %arg9[%c0_69, %c0_70] : memref<256x128xf32, #tpu.memory_space<vmem>>, vector<256x128xf32>
    %cst_71 = arith.constant dense<0.000000e+00> : vector<256x128xf32>
    %52 = tpu.matmul %48, %50, %cst_71 {dimension_numbers = #tpu.dot_dimension_numbers<[1], [0], [0], [1], [0, 0, 1, 1], [], []>} : vector<256x4xf32>, vector<4x128xf32>, vector<256x128xf32> -> vector<256x128xf32>
    %53 = arith.addf %51, %52 : vector<256x128xf32>
    %c0_72 = arith.constant 0 : index
    %c0_73 = arith.constant 0 : index
    %54 = vector.load %arg9[%c0_72, %c0_73] : memref<256x128xf32, #tpu.memory_space<vmem>>, vector<256x128xf32>
    tpu.vector_store %arg9[%c0_72, %c0_73], %53 {strides = array<i32>} : memref<256x128xf32, #tpu.memory_space<vmem>>, vector<256x128xf32>,
    %c2_74 = arith.constant 2 : index
    %c0_75 = arith.constant 0 : index
    %c0_76 = arith.constant 0 : index
    %55 = vector.load %arg8[%c2_74, %c0_75, %c0_76] : memref<18x18x4xf32, #tpu.memory_space<vmem>>, vector<16x16x4xf32>
    %56 = vector.shape_cast %55 : vector<16x16x4xf32> to vector<256x4xf32>
    %c2_77 = arith.constant 2 : index
    %c0_78 = arith.constant 0 : index
    %c0_79 = arith.constant 0 : index
    %57 = vector.load %arg2[%c2_77, %c0_78, %c0_79] : memref<3x12x128xf32, #tpu.memory_space<vmem>>, vector<1x4x128xf32>
    %58 = vector.shape_cast %57 : vector<1x4x128xf32> to vector<4x128xf32>
    %c0_80 = arith.constant 0 : index
    %c0_81 = arith.constant 0 : index
    %59 = vector.load %arg9[%c0_80, %c0_81] : memref<256x128xf32, #tpu.memory_space<vmem>>, vector<256x128xf32>
    %cst_82 = arith.constant dense<0.000000e+00> : vector<256x128xf32>
    %60 = tpu.matmul %56, %58, %cst_82 {dimension_numbers = #tpu.dot_dimension_numbers<[1], [0], [0], [1], [0, 0, 1, 1], [], []>} : vector<256x4xf32>, vector<4x128xf32>, vector<256x128xf32> -> vector<256x128xf32>
    %61 = arith.addf %59, %60 : vector<256x128xf32>
    %c0_83 = arith.constant 0 : index
    %c0_84 = arith.constant 0 : index
    %62 = vector.load %arg9[%c0_83, %c0_84] : memref<256x128xf32, #tpu.memory_space<vmem>>, vector<256x128xf32>
    tpu.vector_store %arg9[%c0_83, %c0_84], %61 {strides = array<i32>} : memref<256x128xf32, #tpu.memory_space<vmem>>, vector<256x128xf32>,
    %c2_85 = arith.constant 2 : index
    %c1_86 = arith.constant 1 : index
    %c0_87 = arith.constant 0 : index
    %63 = vector.load %arg8[%c2_85, %c1_86, %c0_87] : memref<18x18x4xf32, #tpu.memory_space<vmem>>, vector<16x16x4xf32>
    %64 = vector.shape_cast %63 : vector<16x16x4xf32> to vector<256x4xf32>
    %c2_88 = arith.constant 2 : index
    %c4_89 = arith.constant 4 : index
    %c0_90 = arith.constant 0 : index
    %65 = vector.load %arg2[%c2_88, %c4_89, %c0_90] : memref<3x12x128xf32, #tpu.memory_space<vmem>>, vector<1x4x128xf32>
    %66 = vector.shape_cast %65 : vector<1x4x128xf32> to vector<4x128xf32>
    %c0_91 = arith.constant 0 : index
    %c0_92 = arith.constant 0 : index
    %67 = vector.load %arg9[%c0_91, %c0_92] : memref<256x128xf32, #tpu.memory_space<vmem>>, vector<256x128xf32>
    %cst_93 = arith.constant dense<0.000000e+00> : vector<256x128xf32>
    %68 = tpu.matmul %64, %66, %cst_93 {dimension_numbers = #tpu.dot_dimension_numbers<[1], [0], [0], [1], [0, 0, 1, 1], [], []>} : vector<256x4xf32>, vector<4x128xf32>, vector<256x128xf32> -> vector<256x128xf32>
    %69 = arith.addf %67, %68 : vector<256x128xf32>
    %c0_94 = arith.constant 0 : index
    %c0_95 = arith.constant 0 : index
    %70 = vector.load %arg9[%c0_94, %c0_95] : memref<256x128xf32, #tpu.memory_space<vmem>>, vector<256x128xf32>
    tpu.vector_store %arg9[%c0_94, %c0_95], %69 {strides = array<i32>} : memref<256x128xf32, #tpu.memory_space<vmem>>, vector<256x128xf32>,
    %c2_96 = arith.constant 2 : index
    %c2_97 = arith.constant 2 : index
    %c0_98 = arith.constant 0 : index
    %71 = vector.load %arg8[%c2_96, %c2_97, %c0_98] : memref<18x18x4xf32, #tpu.memory_space<vmem>>, vector<16x16x4xf32>
    %72 = vector.shape_cast %71 : vector<16x16x4xf32> to vector<256x4xf32>
    %c2_99 = arith.constant 2 : index
    %c8_100 = arith.constant 8 : index
    %c0_101 = arith.constant 0 : index
    %73 = vector.load %arg2[%c2_99, %c8_100, %c0_101] : memref<3x12x128xf32, #tpu.memory_space<vmem>>, vector<1x4x128xf32>
    %74 = vector.shape_cast %73 : vector<1x4x128xf32> to vector<4x128xf32>
    %c0_102 = arith.constant 0 : index
    %c0_103 = arith.constant 0 : index
    %75 = vector.load %arg9[%c0_102, %c0_103] : memref<256x128xf32, #tpu.memory_space<vmem>>, vector<256x128xf32>
    %cst_104 = arith.constant dense<0.000000e+00> : vector<256x128xf32>
    %76 = tpu.matmul %72, %74, %cst_104 {dimension_numbers = #tpu.dot_dimension_numbers<[1], [0], [0], [1], [0, 0, 1, 1], [], []>} : vector<256x4xf32>, vector<4x128xf32>, vector<256x128xf32> -> vector<256x128xf32>
    %77 = arith.addf %75, %76 : vector<256x128xf32>
    %c0_105 = arith.constant 0 : index
    %c0_106 = arith.constant 0 : index
    %78 = vector.load %arg9[%c0_105, %c0_106] : memref<256x128xf32, #tpu.memory_space<vmem>>, vector<256x128xf32>
    tpu.vector_store %arg9[%c0_105, %c0_106], %77 {strides = array<i32>} : memref<256x128xf32, #tpu.memory_space<vmem>>, vector<256x128xf32>,
    %c0_107 = arith.constant 0 : index
    %c0_108 = arith.constant 0 : index
    %79 = vector.load %arg9[%c0_107, %c0_108] : memref<256x128xf32, #tpu.memory_space<vmem>>, vector<256x128xf32>
    %c0_109 = arith.constant 0 : index
    %c0_110 = arith.constant 0 : index
    %c0_111 = arith.constant 0 : index
    %80 = vector.load %arg5[%c0_109, %c0_110, %c0_111] : memref<1x256x128xf32, #tpu.memory_space<vmem>>, vector<1x256x128xf32>
    %81 = vector.shape_cast %80 : vector<1x256x128xf32> to vector<256x128xf32>
    %82 = vector.shape_cast %79 : vector<256x128xf32> to vector<1x256x128xf32>
    tpu.vector_store %arg5[%c0_109, %c0_110, %c0_111], %82 {strides = array<i32>} : memref<1x256x128xf32, #tpu.memory_space<vmem>>, vector<1x256x128xf32>,
    %cst_112 = arith.constant dense<0.000000e+00> : vector<128xf32>
    %83 = vector.multi_reduction <add>, %79, %cst_112 [0] : vector<256x128xf32> to vector<128xf32>
    %84 = vector.shape_cast %83 : vector<128xf32> to vector<1x128xf32>
    %cst_113 = arith.constant 3.906250e-03 : f32
    %85 = vector.broadcast %cst_113 : f32 to vector<1x128xf32>
    %86 = arith.mulf %84, %85 : vector<1x128xf32>
    %87 = vector.broadcast %86 : vector<1x128xf32> to vector<256x128xf32>
    %88 = arith.subf %79, %87 : vector<256x128xf32>
    %c0_114 = arith.constant 0 : index
    %c0_115 = arith.constant 0 : index
    %c0_116 = arith.constant 0 : index
    %89 = vector.load %arg6[%c0_114, %c0_115, %c0_116] : memref<1x1x128xf32, #tpu.memory_space<vmem>>, vector<1x1x128xf32>
    %90 = vector.shape_cast %89 : vector<1x1x128xf32> to vector<1x128xf32>
    %91 = vector.shape_cast %84 : vector<1x128xf32> to vector<1x1x128xf32>
    tpu.vector_store %arg6[%c0_114, %c0_115, %c0_116], %91 {strides = array<i32>} : memref<1x1x128xf32, #tpu.memory_space<vmem>>, vector<1x1x128xf32>,
    %92 = arith.mulf %88, %88 : vector<256x128xf32>
    %cst_117 = arith.constant dense<0.000000e+00> : vector<128xf32>
    %93 = vector.multi_reduction <add>, %92, %cst_117 [0] : vector<256x128xf32> to vector<128xf32>
    %94 = vector.shape_cast %93 : vector<128xf32> to vector<1x128xf32>
    %c0_118 = arith.constant 0 : index
    %c0_119 = arith.constant 0 : index
    %c0_120 = arith.constant 0 : index
    %95 = vector.load %arg7[%c0_118, %c0_119, %c0_120] : memref<1x1x128xf32, #tpu.memory_space<vmem>>, vector<1x1x128xf32>
    %96 = vector.shape_cast %95 : vector<1x1x128xf32> to vector<1x128xf32>
    %97 = vector.shape_cast %94 : vector<1x128xf32> to vector<1x1x128xf32>
    tpu.vector_store %arg7[%c0_118, %c0_119, %c0_120], %97 {strides = array<i32>} : memref<1x1x128xf32, #tpu.memory_space<vmem>>, vector<1x1x128xf32>,
    return
  }
  func.func @transform_0(%arg0: i32) -> (i32, i32, i32, i32) {
    %c0_i32 = arith.constant 0 : i32
    %c0_i32_0 = arith.constant 0 : i32
    %c0_i32_1 = arith.constant 0 : i32
    %c0_i32_2 = arith.constant 0 : i32
    return %arg0, %c0_i32, %c0_i32_0, %c0_i32_1 : i32, i32, i32, i32
  }
  func.func @transform_1(%arg0: i32) -> (i32, i32, i32) {
    %c0_i32 = arith.constant 0 : i32
    %c0_i32_0 = arith.constant 0 : i32
    %c0_i32_1 = arith.constant 0 : i32
    %c0_i32_2 = arith.constant 0 : i32
    return %c0_i32, %c0_i32_0, %c0_i32_1 : i32, i32, i32
  }
  func.func @transform_2(%arg0: i32) -> (i32, i32) {
    %c0_i32 = arith.constant 0 : i32
    %c0_i32_0 = arith.constant 0 : i32
    %c0_i32_1 = arith.constant 0 : i32
    return %c0_i32, %c0_i32_0 : i32, i32
  }
  func.func @transform_3(%arg0: i32) -> (i32, i32) {
    %c0_i32 = arith.constant 0 : i32
    %c0_i32_0 = arith.constant 0 : i32
    %c0_i32_1 = arith.constant 0 : i32
    return %c0_i32, %c0_i32_0 : i32, i32
  }
  func.func @transform_4(%arg0: i32) -> (i32, i32, i32) {
    %c0_i32 = arith.constant 0 : i32
    %c0_i32_0 = arith.constant 0 : i32
    %c0_i32_1 = arith.constant 0 : i32
    return %arg0, %c0_i32, %c0_i32_0 : i32, i32, i32
  }
  func.func @transform_5(%arg0: i32) -> (i32, i32, i32) {
    %c0_i32 = arith.constant 0 : i32
    %c0_i32_0 = arith.constant 0 : i32
    %c0_i32_1 = arith.constant 0 : i32
    return %arg0, %c0_i32, %c0_i32_0 : i32, i32, i32
  }
  func.func @transform_6(%arg0: i32) -> (i32, i32, i32) {
    %c0_i32 = arith.constant 0 : i32
    %c0_i32_0 = arith.constant 0 : i32
    %c0_i32_1 = arith.constant 0 : i32
    return %arg0, %c0_i32, %c0_i32_0 : i32, i32, i32
  }
}

</mosaic_0001>

<bundles_post_ra>
// kernel: tpu_custom_call.1
= control target key start
LH: loop header
LB: loop body
LE: loop exit
PB: predicated region body
PF: predicated region fallthrough
CT: control target
= control target key end

     0   :  { %12 = vsyncpa [#allocation5], 0  ;;  %s5893_s0 = inlined_call_operand.vmem [shape: f32[2,16,16,4], index: 0, kind: input, shape index: {}]   ;;  %s5894_s1 = inlined_call_operand.vmem [shape: f32[3,12,128], index: 1, kind: input, shape index: {}]   ;;  %s5895_s2 = inlined_call_operand.vmem [shape: f32[1,4], index: 2, kind: input, shape index: {}]   ;;  %s5896_s3 = inlined_call_operand.vmem [shape: f32[1,4], index: 3, kind: input, shape index: {}]   ;;  %s5897_s4 = inlined_call_operand.hbm [shape: f32[2,256,128], index: 4, kind: output, shape index: {0}]   ;;  %s5898_s5 = inlined_call_operand.hbm [shape: f32[2,1,128], index: 5, kind: output, shape index: {1}]   ;;  %s5899_s6 = inlined_call_operand.hbm [shape: f32[2,1,128], index: 6, kind: output, shape index: {2}]  }
   0x1   :  { %14 = vsyncpa [#allocation5 + $0x1], 0 }
   0x2   :  { %15 = vsyncpa [#allocation7], 0 }
   0x3   :  { %17 = vsyncpa [#allocation7 + $0x1], 0  ;;  %s4396_s21 = smov 0   ;;  %s4398_s22 = smov 0  }
   0x4   :  { %s4400_s2 = smov 0   ;;  %s4402_s3 = smov 0  }
   0x5 LB: > { %s4417_s23 = sadd.s32 4294967295, %s4356_s3   ;;  %s3862_s24 = sadd.s32 4294967294, %s4356_s3   ;;  %s4356_s3 = sphi %s4402_s3, %s6025_s3   ;;  %s4352_s2 = sphi %s4400_s2, %s6024_s2   ;;  %s4348_s22 = sphi %s4398_s22, %s6023_s22   ;;  %s4344_s21 = sphi %s4396_s21, %s6022_s21  }
   0x6   : > { %s4421_s25 = sadd.s32 1, %s4356_s3   ;;  %s119_s26 = sadd.s32 1, %s4352_s2 }
   0x7   : > { %s116_s27 = ssub.s32 %s4356_s3, %s4421_s25  ;;  %p129_p0 = scmp.ne.s32.totalorder %s4352_s2, %s4348_s22 }
   0x8   : > { %p117_p1 = scmp.eq.s32.totalorder %s116_s27, 0  ;;  %p130_p2 = scmp.eq.s32.totalorder %s4417_s23, 1 }
   0x9   : > { %p135_p3 = scmp.ne.s32.totalorder %s4348_s22, %s4344_s21  ;;  %p136_p4 = scmp.eq.s32.totalorder %s3862_s24, 1 }
   0xa   : > { %s4434_s28 = scalar_select %p117_p1, %s4352_s2, %s119_s26  }
   0xb   : > { %p4436_p5 = por %p130_p2, %p129_p0  ;;  %p4440_p6 = por %p136_p4, %p135_p3 }
   0xc   : > { %p3865_p7 = scmp.ge.s32.totalorder %s4356_s3, 1  ;;  %p223_p8 = scmp.lt.s32.totalorder %s4356_s3, 3 }
   0xe   : > { %p224_p9 = pnand %p3865_p7, %p223_p8 }
  0x10   : > { %227 = sbr.rel (%p224_p9) target bundleno = 888 (0x378), region = 36 }
  0x15   : > { %v451_v0 = vld [vmem:[%s5894_s1] sm:$0xf]  ;;  %vm580_vm0 = vcmask 1043456   ;;  %p261_p10 = scmp.lt.s32.totalorder %s4417_s23, 1  ;;  %vm298_vm1 = vcmask 31744   ;;  %v4358_v1 = vmov 0.0  }
  0x16   : > { %4179 = vmatpush.msk.msra.mxu1 %vm580_vm0, %v451_v0  ;;  %4180 = vmatpush.msk.msra.mxu2 %vm580_vm0, %v451_v0  ;;  %312 = vst.msk [vmem:[#allocation2 + $0x60] sm:$0xff] %vm298_vm1, %v4358_v1  ;;  %v1134_v4 = vld [vmem:[%s5894_s1 + $0x8] sm:$0xf]  ;;  %v3968_v5 = vld [vmem:[%s5894_s1 + $0x10] sm:$0xf]  ;;  %vm301_vm2 = vcmask 25600  }
  0x17   : > { %s262_s9 = scalar_select %p261_p10, %s4417_s23, 1  ;;  %313 = vst.msk [vmem:[#allocation2 + $0x68] sm:$0xff] %vm298_vm1, %v4358_v1  ;;  %4181 = vmatpush.msk.msra.mxu3 %vm580_vm0, %v451_v0  ;;  %3869 = vmatpush.msk.msra.mxu0 %vm580_vm0, %v451_v0  ;;  %v793_v6 = vld [vmem:[%s5894_s1 + $0x4] sm:$0xf]  ;;  %v4002_v10 = vld [vmem:[%s5894_s1 + $0x14] sm:$0xf] }
  0x18   : > { %299 = vst.msk [vmem:[#allocation2] sm:$0xff] %vm298_vm1, %v4358_v1  ;;  %3935 = vmatpush.msk.msrb.mxu2 %vm580_vm0, %v1134_v4  ;;  %3902 = vmatpush.msk.msrb.mxu1 %vm580_vm0, %v793_v6  ;;  %v4070_v57 = vld [vmem:[%s5894_s1 + $0x20] sm:$0xf]  ;;  %v4104_v58 = vld [vmem:[%s5894_s1 + $0x24] sm:$0xf]  ;;  %s4178_s17 = sshll.u32 %s4417_s23, 8 }
  0x19   : > { %s4177_s10 = sshll.u32 %s262_s9, 8  ;;  %300 = vst.msk [vmem:[#allocation2 + $0x8] sm:$0xff] %vm298_vm1, %v4358_v1  ;;  %3969 = vmatpush.msk.msrb.mxu3 %vm580_vm0, %v3968_v5  ;;  %4003 = vmatpush.msk.msrb.mxu0 %vm580_vm0, %v4002_v10  ;;  %v4036_v59 = vld [vmem:[%s5894_s1 + $0x18] sm:$0xf]  ;;  %v4138_v0 = vld [vmem:[%s5894_s1 + $0x28] sm:$0xf]  ;;  %s3717_s20 = scalar_lea.hbm %s5897_s4, %s4178_s17 }
  0x1a   : > { %s4466_s13 = scalar_lea.vmem %s5893_s0, %s4177_s10  ;;  %303 = vst.msk [vmem:[#allocation2 + $0x18] sm:$0xff] %vm298_vm1, %v4358_v1  ;;  %s3720_s27 = sshll.u32 %s3717_s20, 4  ;;  %s3721_s27 = int_to_ptr.hbm [resolvable:$true] %s3720_s27 }
  0x1b   : > { %v272_v2 = vld [vmem:[%s4466_s13 + $0x30] sm:$0xff]  ;;  %304 = vst.msk [vmem:[#allocation2 + $0x20] sm:$0xff] %vm298_vm1, %v4358_v1  ;;  %v273_v11 = vld [vmem:[%s4466_s13 + $0x38] sm:$0xff]  ;;  %v274_v18 = vld [vmem:[%s4466_s13 + $0x40] sm:$0xff]  ;;  %s4248_s8 = sshra.s32 %s3721_s27, 4  ;;  %s4254_s12 = scalar_lea.hbm %s5897_s4, 512  ;;  %s4249_s8 = int_to_ptr.hbm [resolvable:$true] %s4248_s8 }
  0x1c   : > { %361 = vst.msk [vmem:[#allocation2 + $0x61] sm:$0xff] %vm298_vm1, %v272_v2  ;;  %v280_v7 = vld [vmem:[%s4466_s13 + $0x70] sm:$0xff]  ;;  %v281_v16 = vld [vmem:[%s4466_s13 + $0x78] sm:$0xff]  ;;  %v282_v19 = vld [vmem:[%s4466_s13 + $0x80] sm:$0xff]  ;;  %s4250_s9 = scalar_lea.hbm %s4249_s8, 256  ;;  %p4255_p0 = scmp.lt.s32.totalorder %s4249_s8, %s5897_s4 }
  0x1d   : > { %306 = vst.msk [vmem:[#allocation2 + $0x30] sm:$0xff] %vm298_vm1, %v4358_v1  ;;  %v288_v9 = vld [vmem:[%s4466_s13 + $0xb0] sm:$0xff]  ;;  %v289_v17 = vld [vmem:[%s4466_s13 + $0xb8] sm:$0xff]  ;;  %v290_v20 = vld [vmem:[%s4466_s13 + $0xc0] sm:$0xff]  ;;  %p4251_p11 = scmp.ne.s32.totalorder %s4249_s8, %s4250_s9  ;;  %p4256_p1 = scmp.lt.s32.totalorder %s4254_s12, %s4250_s9 }
  0x1e   : > { %307 = vst.msk [vmem:[#allocation2 + $0x38] sm:$0xff] %vm298_vm1, %v4358_v1  ;;  %v275_v21 = vld [vmem:[%s4466_s13 + $0x48] sm:$0xff]  ;;  %v266_v23 = vld [vmem:[%s4466_s13] sm:$0xff]  ;;  %v276_v25 = vld [vmem:[%s4466_s13 + $0x50] sm:$0xff] }
  0x1f   : > { %309 = vst.msk [vmem:[#allocation2 + $0x48] sm:$0xff] %vm298_vm1, %v4358_v1  ;;  %v419_v8 = vld [vmem:[#allocation2] sm:$0xff]  ;;  %v283_v22 = vld [vmem:[%s4466_s13 + $0x88] sm:$0xff]  ;;  %v284_v27 = vld [vmem:[%s4466_s13 + $0x90] sm:$0xff]  ;;  %p4252_p12 = pnand %p4251_p11, %p4436_p5  ;;  %p4257_p2 = por %p4256_p1, %p4255_p0 }
  0x20   : > { %310 = vst.msk [vmem:[#allocation2 + $0x50] sm:$0xff] %vm298_vm1, %v4358_v1  ;;  %3870 = vmatmul.msk.f32.vlgmr.msra.gmra.mxu0 %vm298_vm1, %v419_v8  ;;  %v420_v12 = vld [vmem:[#allocation2 + $0x8] sm:$0xff]  ;;  %v292_v31 = vld [vmem:[%s4466_s13 + $0xd0] sm:$0xff]  ;;  %v277_v32 = vld [vmem:[%s4466_s13 + $0x58] sm:$0xff] }
  0x21   : > { %315 = vst.msk [vmem:[#allocation2 + $0x78] sm:$0xff] %vm298_vm1, %v4358_v1  ;;  %v291_v24 = vld [vmem:[%s4466_s13 + $0xc8] sm:$0xff]  ;;  %v285_v33 = vld [vmem:[%s4466_s13 + $0x98] sm:$0xff]  ;;  %v268_v34 = vld [vmem:[%s4466_s13 + $0x10] sm:$0xff]  ;;  %4139 = vmatpush.msk.msra.mxu0 %vm580_vm0, %v4138_v0  ;;  %p4253_p13 = pneg %p4252_p12 }
  0x22   : > { %316 = vst.msk [vmem:[#allocation2 + $0x80] sm:$0xff] %vm298_vm1, %v4358_v1  ;;  %v267_v29 = vld [vmem:[%s4466_s13 + $0x8] sm:$0xff]  ;;  %v293_v36 = vld [vmem:[%s4466_s13 + $0xd8] sm:$0xff]  ;;  %v278_v39 = vld [vmem:[%s4466_s13 + $0x60] sm:$0xff] }
  0x23   : > { %v4486_v3 = vld [vmem:[#allocation2 + $0x60] sm:$0xff]  ;;  %318 = vst.msk [vmem:[#allocation2 + $0x90] sm:$0xff] %vm298_vm1, %v4358_v1  ;;  %v269_v42 = vld [vmem:[%s4466_s13 + $0x18] sm:$0xff]  ;;  %v279_v44 = vld [vmem:[%s4466_s13 + $0x68] sm:$0xff]  ;;  %p4258_p3 = pnand %p4257_p2, %p4253_p13 }
  0x24   : > { %3878 = vmatmul.msk.f32.vlgmr.msra.gmra.mxu1 %vm298_vm1, %v4486_v3  ;;  %319 = vst.msk [vmem:[#allocation2 + $0x98] sm:$0xff] %vm298_vm1, %v4358_v1  ;;  %v286_v41 = vld [vmem:[%s4466_s13 + $0xa0] sm:$0xff]  ;;  %v287_v45 = vld [vmem:[%s4466_s13 + $0xa8] sm:$0xff] }
  0x25   : > { %321 = vst.msk [vmem:[#allocation2 + $0xa8] sm:$0xff] %vm298_vm1, %v4358_v1  ;;  %v294_v43 = vld [vmem:[%s4466_s13 + $0xe0] sm:$0xff]  ;;  %v295_v49 = vld [vmem:[%s4466_s13 + $0xe8] sm:$0xff]  ;;  %4037 = vmatpush.msk.msra.mxu1 %vm580_vm0, %v4036_v59 }
  0x26   : > { %322 = vst.msk [vmem:[#allocation2 + $0xb0] sm:$0xff] %vm298_vm1, %v4358_v1  ;;  %v270_v47 = vld [vmem:[%s4466_s13 + $0x20] sm:$0xff]  ;;  %v271_v52 = vld [vmem:[%s4466_s13 + $0x28] sm:$0xff] }
  0x27   : > { %324 = vst.msk [vmem:[#allocation2 + $0xc0] sm:$0xff] %vm298_vm1, %v4358_v1 }
  0x28   : > { %325 = vst.msk [vmem:[#allocation2 + $0xc8] sm:$0xff] %vm298_vm1, %v4358_v1  ;;  %3871 = vmatmul.msk.f32.gmra.mxu0 %vm298_vm1, %v420_v12 }
  0x29   : > { %327 = vst.msk [vmem:[#allocation2 + $0xd8] sm:$0xff] %vm298_vm1, %v4358_v1 }
  0x2a   : > { %328 = vst.msk [vmem:[#allocation2 + $0xe0] sm:$0xff] %vm298_vm1, %v4358_v1 }
  0x2b   : > { %330 = vst.msk [vmem:[#allocation2 + $0xf0] sm:$0xff] %vm298_vm1, %v4358_v1 }
  0x2c   : > { %331 = vst.msk [vmem:[#allocation2 + $0xf8] sm:$0xff] %vm298_vm1, %v4358_v1 }
  0x2d   : > { %333 = vst.msk [vmem:[#allocation2 + $0x108] sm:$0xff] %vm298_vm1, %v4358_v1 }
  0x2e   : > { %334 = vst.msk [vmem:[#allocation2 + $0x110] sm:$0xff] %vm298_vm1, %v4358_v1 }
  0x2f   : > { %336 = vst.msk [vmem:[#allocation2 + $0x120] sm:$0xff] %vm298_vm1, %v4358_v1 }
  0x30   : > { %337 = vst.msk [vmem:[#allocation2 + $0x128] sm:$0xff] %vm298_vm1, %v4358_v1 }
  0x31   : > { %339 = vst.msk [vmem:[#allocation2 + $0x138] sm:$0xff] %vm298_vm1, %v4358_v1 }
  0x32   : > { %340 = vst.msk [vmem:[#allocation2 + $0x140] sm:$0xff] %vm298_vm1, %v4358_v1 }
  0x33   : > { %342 = vst.msk [vmem:[#allocation2 + $0x150] sm:$0xff] %vm298_vm1, %v4358_v1 }
  0x34   : > { %343 = vst.msk [vmem:[#allocation2 + $0x158] sm:$0xff] %vm298_vm1, %v4358_v1 }
  0x35   : > { %345 = vst.msk [vmem:[#allocation2 + $0x168] sm:$0xff] %vm298_vm1, %v4358_v1 }
  0x36   : > { %346 = vst.msk [vmem:[#allocation2 + $0x170] sm:$0xff] %vm298_vm1, %v4358_v1 }
  0x37   : > { %348 = vst.msk [vmem:[#allocation2 + $0x180] sm:$0xff] %vm298_vm1, %v4358_v1 }
  0x38   : > { %349 = vst.msk [vmem:[#allocation2 + $0x188] sm:$0xff] %vm298_vm1, %v4358_v1 }
  0x39   : > { %351 = vst.msk [vmem:[#allocation2 + $0x198] sm:$0xff] %vm298_vm1, %v4358_v1 }
  0x3a   : > { %352 = vst.msk [vmem:[#allocation2 + $0x1a0] sm:$0xff] %vm298_vm1, %v4358_v1 }
  0x3b   : > { %369 = vst.msk [vmem:[#allocation2 + $0xc1] sm:$0xff] %vm298_vm1, %v280_v7 }
  0x3c   : > { %377 = vst.msk [vmem:[#allocation2 + $0x121] sm:$0xff] %vm298_vm1, %v288_v9  ;;  %v761_v9 = vld [vmem:[#allocation2 + $0x1] sm:$0xff] }
  0x3d   : > { %314 = vst.msk [vmem:[#allocation2 + $0x70] sm:$0x3] %vm301_vm2, %v4358_v1 }
  0x3e   : > { %362 = vst.msk [vmem:[#allocation2 + $0x69] sm:$0xff] %vm298_vm1, %v273_v11  ;;  %v1102_v11 = vld [vmem:[#allocation2 + $0x2] sm:$0xff] }
  0x3f   : > { %302 = vst.msk [vmem:[#allocation2 + $0x10] sm:$0x3] %vm301_vm2, %v4358_v1 }
  0x40   : > { %305 = vst.msk [vmem:[#allocation2 + $0x28] sm:$0x3] %vm301_vm2, %v4358_v1 }
  0x41   : > { %308 = vst.msk [vmem:[#allocation2 + $0x40] sm:$0x3] %vm301_vm2, %v4358_v1 }
  0x42   : > { %v4570_v13 = vld [vmem:[#allocation2 + $0xc0] sm:$0xff]  ;;  %311 = vst.msk [vmem:[#allocation2 + $0x58] sm:$0x3] %vm301_vm2, %v4358_v1 }
  0x43   : > { %3886 = vmatmul.msk.f32.vlgmr.msra.gmra.mxu2 %vm298_vm1, %v4570_v13  ;;  %v4576_v14 = vld [vmem:[#allocation2 + $0x120] sm:$0xff]  ;;  %317 = vst.msk [vmem:[#allocation2 + $0x88] sm:$0x3] %vm301_vm2, %v4358_v1 }
  0x44   : > { %3894 = vmatmul.msk.f32.vlgmr.msra.gmra.mxu3 %vm298_vm1, %v4576_v14  ;;  %320 = vst.msk [vmem:[#allocation2 + $0xa0] sm:$0x3] %vm301_vm2, %v4358_v1  ;;  %4071 = vmatpush.msk.msra.mxu2 %vm580_vm0, %v4070_v57 }
  0x45   : > { %v4584_v15 = vld [vmem:[#allocation2 + $0x68] sm:$0xff]  ;;  %323 = vst.msk [vmem:[#allocation2 + $0xb8] sm:$0x3] %vm301_vm2, %v4358_v1  ;;  %4105 = vmatpush.msk.msra.mxu3 %vm580_vm0, %v4104_v58 }
  0x46   : > { %3879 = vmatmul.msk.f32.gmra.mxu1 %vm298_vm1, %v4584_v15  ;;  %326 = vst.msk [vmem:[#allocation2 + $0xd0] sm:$0x3] %vm301_vm2, %v4358_v1  ;;  %v762_v12 = vld [vmem:[#allocation2 + $0x9] sm:$0xff] }
  0x47   : > { %329 = vst.msk [vmem:[#allocation2 + $0xe8] sm:$0x3] %vm301_vm2, %v4358_v1 }
  0x48   : > { %332 = vst.msk [vmem:[#allocation2 + $0x100] sm:$0x3] %vm301_vm2, %v4358_v1 }
  0x49   : > { %335 = vst.msk [vmem:[#allocation2 + $0x118] sm:$0x3] %vm301_vm2, %v4358_v1 }
  0x4a   : > { %338 = vst.msk [vmem:[#allocation2 + $0x130] sm:$0x3] %vm301_vm2, %v4358_v1 }
  0x4b   : > { %341 = vst.msk [vmem:[#allocation2 + $0x148] sm:$0x3] %vm301_vm2, %v4358_v1 }
  0x4c   : > { %344 = vst.msk [vmem:[#allocation2 + $0x160] sm:$0x3] %vm301_vm2, %v4358_v1 }
  0x4d   : > { %347 = vst.msk [vmem:[#allocation2 + $0x178] sm:$0x3] %vm301_vm2, %v4358_v1 }
  0x4e   : > { %350 = vst.msk [vmem:[#allocation2 + $0x190] sm:$0x3] %vm301_vm2, %v4358_v1 }
  0x4f   : > { %353 = vst.msk [vmem:[#allocation2 + $0x1a8] sm:$0x3] %vm301_vm2, %v4358_v1 }
  0x50   : > { %370 = vst.msk [vmem:[#allocation2 + $0xc9] sm:$0xff] %vm298_vm1, %v281_v16 }
  0x51   : > { %378 = vst.msk [vmem:[#allocation2 + $0x129] sm:$0xff] %vm298_vm1, %v289_v17  ;;  %v1103_v17 = vld [vmem:[#allocation2 + $0xa] sm:$0xff] }
  0x52   : > { %363 = vst.msk [vmem:[#allocation2 + $0x79] sm:$0xff] %vm298_vm1, %v274_v18 }
  0x53   : > { %371 = vst.msk [vmem:[#allocation2 + $0xd9] sm:$0xff] %vm298_vm1, %v282_v19 }
  0x54   : > { %379 = vst.msk [vmem:[#allocation2 + $0x139] sm:$0xff] %vm298_vm1, %v290_v20 }
  0x55   : > { %364 = vst.msk [vmem:[#allocation2 + $0x81] sm:$0xff] %vm298_vm1, %v275_v21 }
  0x56   : > { %372 = vst.msk [vmem:[#allocation2 + $0xe1] sm:$0xff] %vm298_vm1, %v283_v22 }
  0x57   : > { %v4627_v26 = vld [vmem:[#allocation2 + $0xc8] sm:$0xff]  ;;  %355 = vst.msk [vmem:[#allocation2 + $0x19] sm:$0xff] %vm298_vm1, %v266_v23 }
  0x58   : > { %3887 = vmatmul.msk.f32.gmra.mxu2 %vm298_vm1, %v4627_v26  ;;  %v4633_v28 = vld [vmem:[#allocation2 + $0x128] sm:$0xff]  ;;  %380 = vst.msk [vmem:[#allocation2 + $0x141] sm:$0xff] %vm298_vm1, %v291_v24 }
  0x59   : > { %3895 = vmatmul.msk.f32.gmra.mxu3 %vm298_vm1, %v4633_v28  ;;  %v4639_v30 = vld [vmem:[#allocation2 + $0x78] sm:$0xff]  ;;  %365 = vst.msk [vmem:[#allocation2 + $0x91] sm:$0xff] %vm298_vm1, %v276_v25 }
  0x5a   : > { %3880 = vmatmul.msk.f32.gmra.mxu1 %vm298_vm1, %v4639_v30  ;;  %373 = vst.msk [vmem:[#allocation2 + $0xf1] sm:$0xff] %vm298_vm1, %v284_v27  ;;  %v4651_v35 = vld [vmem:[#allocation2 + $0xd8] sm:$0xff]  ;;  %v4840_v27 = vld [vmem:[#allocation2 + $0x61] sm:$0xff] }
  0x5b   : > { %356 = vst.msk [vmem:[#allocation2 + $0x21] sm:$0xff] %vm298_vm1, %v267_v29  ;;  %v4655_v37 = vld [vmem:[#allocation2 + $0x138] sm:$0xff] }
  0x5c   : > { %381 = vst.msk [vmem:[#allocation2 + $0x151] sm:$0xff] %vm298_vm1, %v292_v31  ;;  %v4661_v40 = vld [vmem:[#allocation2 + $0x80] sm:$0xff] }
  0x5d   : > { %366 = vst.msk [vmem:[#allocation2 + $0x99] sm:$0xff] %vm298_vm1, %v277_v32  ;;  %v4685_v48 = vld [vmem:[#allocation2 + $0xe0] sm:$0xff]  ;;  %v4854_v32 = vld [vmem:[#allocation2 + $0x69] sm:$0xff] }
  0x5e   : > { %v4657_v38 = vld [vmem:[#allocation2 + $0x18] sm:$0xff]  ;;  %374 = vst.msk [vmem:[#allocation2 + $0xf9] sm:$0xff] %vm298_vm1, %v285_v33  ;;  %v4930_v0 = vld [vmem:[#allocation2 + $0x82] sm:$0xff] }
  0x5f   : > { %3872 = vmatmul.msk.f32.gmra.mxu0 %vm298_vm1, %v4657_v38  ;;  %357 = vst.msk [vmem:[#allocation2 + $0x31] sm:$0xff] %vm298_vm1, %v268_v34  ;;  %v4689_v50 = vld [vmem:[#allocation2 + $0x140] sm:$0xff] }
  0x60   : > { %3888 = vmatmul.msk.f32.gmra.mxu2 %vm298_vm1, %v4651_v35  ;;  %382 = vst.msk [vmem:[#allocation2 + $0x159] sm:$0xff] %vm298_vm1, %v293_v36  ;;  %v4692_v51 = vld [vmem:[#allocation2 + $0x90] sm:$0xff]  ;;  %v1785_v10 = vld [vmem:[#allocation2 + $0x19] sm:$0xff]  ;;  %v4870_v36 = vld [vmem:[#allocation2 + $0x62] sm:$0xff] }
  0x61   : > { %3896 = vmatmul.msk.f32.gmra.mxu3 %vm298_vm1, %v4655_v37  ;;  %367 = vst.msk [vmem:[#allocation2 + $0xa9] sm:$0xff] %vm298_vm1, %v278_v39  ;;  %v4708_v54 = vld [vmem:[#allocation2 + $0xf0] sm:$0xff] }
  0x62   : > { %3881 = vmatmul.msk.f32.gmra.mxu1 %vm298_vm1, %v4661_v40  ;;  %375 = vst.msk [vmem:[#allocation2 + $0x109] sm:$0xff] %vm298_vm1, %v286_v41  ;;  %v4681_v46 = vld [vmem:[#allocation2 + $0x20] sm:$0xff] }
  0x63   : > { %358 = vst.msk [vmem:[#allocation2 + $0x39] sm:$0xff] %vm298_vm1, %v269_v42  ;;  %v4710_v55 = vld [vmem:[#allocation2 + $0x150] sm:$0xff]  ;;  %v1786_v16 = vld [vmem:[#allocation2 + $0x21] sm:$0xff] }
  0x64   : > { %383 = vst.msk [vmem:[#allocation2 + $0x169] sm:$0xff] %vm298_vm1, %v294_v43  ;;  %v4712_v56 = vld [vmem:[#allocation2 + $0x98] sm:$0xff]  ;;  %v4806_v21 = vld [vmem:[#allocation2 + $0x22] sm:$0xff]  ;;  %v4890_v43 = vld [vmem:[#allocation2 + $0x6a] sm:$0xff] }
  0x65   : > { %368 = vst.msk [vmem:[#allocation2 + $0xb1] sm:$0xff] %vm298_vm1, %v279_v44  ;;  %v4736_v61 = vld [vmem:[#allocation2 + $0xf8] sm:$0xff]  ;;  %v4888_v42 = vld [vmem:[#allocation2 + $0x81] sm:$0xff] }
  0x66   : > { %376 = vst.msk [vmem:[#allocation2 + $0x111] sm:$0xff] %vm298_vm1, %v287_v45  ;;  %v4706_v53 = vld [vmem:[#allocation2 + $0x30] sm:$0xff]  ;;  %v4795_v19 = vld [vmem:[#allocation2 + $0x1a] sm:$0xff] }
  0x67   : > { %3873 = vmatmul.msk.f32.gmra.mxu0 %vm298_vm1, %v4681_v46  ;;  %359 = vst.msk [vmem:[#allocation2 + $0x49] sm:$0xff] %vm298_vm1, %v270_v47  ;;  %v4738_v62 = vld [vmem:[#allocation2 + $0x158] sm:$0xff] }
  0x68   : > { %3889 = vmatmul.msk.f32.gmra.mxu2 %vm298_vm1, %v4685_v48  ;;  %384 = vst.msk [vmem:[#allocation2 + $0x171] sm:$0xff] %vm298_vm1, %v295_v49  ;;  %v4740_v63 = vld [vmem:[#allocation2 + $0xa8] sm:$0xff]  ;;  %v4793_v18 = vld [vmem:[#allocation2 + $0x31] sm:$0xff]  ;;  %v4910_v49 = vld [vmem:[#allocation2 + $0x7a] sm:$0xff] }
  0x69   : > { %3897 = vmatmul.msk.f32.gmra.mxu3 %vm298_vm1, %v4689_v50  ;;  %360 = vst.msk [vmem:[#allocation2 + $0x51] sm:$0xff] %vm298_vm1, %v271_v52  ;;  %v4756_v2 = vld [vmem:[#allocation2 + $0x108] sm:$0xff]  ;;  %v4908_v47 = vld [vmem:[#allocation2 + $0x91] sm:$0xff]  ;;  %v4928_v59 = vld [vmem:[#allocation2 + $0x99] sm:$0xff] }
  0x6a   : > { %3882 = vmatmul.msk.f32.gmra.mxu1 %vm298_vm1, %v4692_v51  ;;  %v4734_v60 = vld [vmem:[#allocation2 + $0x38] sm:$0xff]  ;;  %5930 = vst [vmem:[#allocation11_spill] sm:$0xff] %v4840_v27 }
  0x6b   : > { %v4758_v4 = vld [vmem:[#allocation2 + $0x168] sm:$0xff]  ;;  %v4804_v20 = vld [vmem:[#allocation2 + $0x39] sm:$0xff]  ;;  %5931 = vst [vmem:[#allocation12_spill] sm:$0xff] %v4854_v32 }
  0x6c   : > { %v4760_v5 = vld [vmem:[#allocation2 + $0xb0] sm:$0xff]  ;;  %v4830_v25 = vld [vmem:[#allocation2 + $0x3a] sm:$0xff]  ;;  %5934 = vst [vmem:[#allocation15_spill] sm:$0xff] %v4888_v42 }
  0x6d   : > { %v4772_v7 = vld [vmem:[#allocation2 + $0x110] sm:$0xff]  ;;  %5935 = vst [vmem:[#allocation16_spill] sm:$0xff] %v4890_v43 }
  0x6e   : > { %v4754_v1 = vld [vmem:[#allocation2 + $0x48] sm:$0xff]  ;;  %v4818_v23 = vld [vmem:[#allocation2 + $0x32] sm:$0xff]  ;;  %5937 = vst [vmem:[#allocation18_spill] sm:$0xff] %v4908_v47 }
  0x6f   : > { %3874 = vmatmul.msk.f32.gmra.mxu0 %vm298_vm1, %v4706_v53  ;;  %v4774_v8 = vld [vmem:[#allocation2 + $0x170] sm:$0xff]  ;;  %5938 = vst [vmem:[#allocation19_spill] sm:$0xff] %v4910_v49 }
  0x70   : > { %3890 = vmatmul.msk.f32.gmra.mxu2 %vm298_vm1, %v4708_v54  ;;  %v4770_v6 = vld [vmem:[#allocation2 + $0x50] sm:$0xff]  ;;  %5940 = vst [vmem:[#allocation21_spill] sm:$0xff] %v4928_v59 }
  0x71   : > { %3898 = vmatmul.msk.f32.gmra.mxu3 %vm298_vm1, %v4710_v55  ;;  %v4816_v22 = vld [vmem:[#allocation2 + $0x49] sm:$0xff]  ;;  %v4828_v24 = vld [vmem:[#allocation2 + $0x51] sm:$0xff]  ;;  %5941 = vst [vmem:[#allocation22_spill] sm:$0xff] %v4930_v0 }
  0x72   : > { %3883 = vmatmul.msk.f32.gmra.mxu1 %vm298_vm1, %v4712_v56  ;;  %v4842_v29 = vld [vmem:[#allocation2 + $0x4a] sm:$0xff]  ;;  %v4856_v33 = vld [vmem:[#allocation2 + $0x52] sm:$0xff] }
  0x77   : > { %3875 = vmatmul.msk.f32.gmra.mxu0 %vm298_vm1, %v4734_v60 }
  0x78   : > { %3891 = vmatmul.msk.f32.gmra.mxu2 %vm298_vm1, %v4736_v61 }
  0x79   : > { %3899 = vmatmul.msk.f32.gmra.mxu3 %vm298_vm1, %v4738_v62 }
  0x7a   : > { %3884 = vmatmul.msk.f32.gmra.mxu1 %vm298_vm1, %v4740_v63 }
  0x7f   : > { %3876 = vmatmul.msk.f32.gmra.mxu0 %vm298_vm1, %v4754_v1 }
  0x80   : > { %3892 = vmatmul.msk.f32.gmra.mxu2 %vm298_vm1, %v4756_v2 }
  0x81   : > { %3900 = vmatmul.msk.f32.gmra.mxu3 %vm298_vm1, %v4758_v4 }
  0x82   : > { %3885 = vmatmul.msk.f32.gmra.mxu1 %vm298_vm1, %v4760_v5 }
  0x87   : > { %3877 = vmatmul.msk.f32.gmra.mxu0 %vm298_vm1, %v4770_v6 }
  0x88   : > { %3893 = vmatmul.msk.f32.gmra.mxu2 %vm298_vm1, %v4772_v7 }
  0x89   : > { %3901 = vmatmul.msk.f32.gmra.mxu3 %vm298_vm1, %v4774_v8 }
  0x8a   : > { %3903 = vmatmul.msk.f32.vlgmr.msrb.gmra.mxu1 %vm298_vm1, %v761_v9 }
  0x8f   : > { %4004 = vmatmul.msk.f32.vlgmr.msrb.gmra.mxu0 %vm298_vm1, %v1785_v10 }
  0x90   : > { %3936 = vmatmul.msk.f32.vlgmr.msrb.gmra.mxu2 %vm298_vm1, %v1102_v11 }
  0x91   : > { %3970 = vmatmul.msk.f32.vlgmr.msrb.gmra.mxu3 %vm298_vm1, %v4657_v38 }
  0x92   : > { %3904 = vmatmul.msk.f32.gmra.mxu1 %vm298_vm1, %v762_v12  ;;  %v4948_v12 = vld [vmem:[#allocation2 + $0xa9] sm:$0xff] }
  0x93   : > { %5943 = vst [vmem:[#allocation24_spill] sm:$0xff] %v4948_v12 }
  0x97   : > { %4005 = vmatmul.msk.f32.gmra.mxu0 %vm298_vm1, %v1786_v16 }
  0x98   : > { %3937 = vmatmul.msk.f32.gmra.mxu2 %vm298_vm1, %v1103_v17 }
  0x99   : > { %3971 = vmatmul.msk.f32.gmra.mxu3 %vm298_vm1, %v4681_v46 }
  0x9a   : > { %3905 = vmatmul.msk.f32.gmra.mxu1 %vm298_vm1, %v1785_v10 }
  0x9d   : > { %v4862_v34 = vpop.f32.mrf.mxu0 }
  0x9f   : > { %4006 = vmatmul.msk.f32.gmra.mxu0 %vm298_vm1, %v4793_v18 }
  0xa0   : > { %3938 = vmatmul.msk.f32.gmra.mxu2 %vm298_vm1, %v4795_v19 }
  0xa1   : > { %3972 = vmatmul.msk.f32.gmra.mxu3 %vm298_vm1, %v4706_v53  ;;  %v4852_v31 = vpop.f32.mrf.mxu1 }
  0xa2   : > { %3906 = vmatmul.msk.f32.gmra.mxu1 %vm298_vm1, %v1786_v16  ;;  %v4950_v16 = vld [vmem:[#allocation2 + $0x92] sm:$0xff] }
  0xa3   : > { %5944 = vst [vmem:[#allocation25_spill] sm:$0xff] %v4950_v16 }
  0xa5   : > { %v4886_v41 = vpop.f32.mrf.mxu0 }
  0xa7   : > { %4007 = vmatmul.msk.f32.gmra.mxu0 %vm298_vm1, %v4804_v20 }
  0xa8   : > { %3939 = vmatmul.msk.f32.gmra.mxu2 %vm298_vm1, %v4806_v21 }
  0xa9   : > { %3973 = vmatmul.msk.f32.gmra.mxu3 %vm298_vm1, %v4734_v60 }
  0xaa   : > { %3907 = vmatmul.msk.f32.gmra.mxu1 %vm298_vm1, %v4793_v18 }
  0xaf   : > { %4008 = vmatmul.msk.f32.gmra.mxu0 %vm298_vm1, %v4816_v22 }
  0xb0   : > { %3940 = vmatmul.msk.f32.gmra.mxu2 %vm298_vm1, %v4818_v23 }
  0xb1   : > { %3974 = vmatmul.msk.f32.gmra.mxu3 %vm298_vm1, %v4754_v1 }
  0xb2   : > { %3908 = vmatmul.msk.f32.gmra.mxu1 %vm298_vm1, %v4804_v20 }
  0xb7   : > { %4009 = vmatmul.msk.f32.gmra.mxu0 %vm298_vm1, %v4828_v24 }
  0xb8   : > { %3941 = vmatmul.msk.f32.gmra.mxu2 %vm298_vm1, %v4830_v25 }
  0xb9   : > { %3975 = vmatmul.msk.f32.gmra.mxu3 %vm298_vm1, %v4770_v6 }
  0xba   : > { %3909 = vmatmul.msk.f32.gmra.mxu1 %vm298_vm1, %v4816_v22 }
  0xbf   : > { %4010 = vmatmul.msk.f32.gmra.mxu0 %vm298_vm1, %v4840_v27 }
  0xc0   : > { %3942 = vmatmul.msk.f32.gmra.mxu2 %vm298_vm1, %v4842_v29 }
  0xc1   : > { %3976 = vmatmul.msk.f32.gmra.mxu3 %vm298_vm1, %v4486_v3  ;;  %v4868_v3 = vld [vmem:[#allocation2 + $0x79] sm:$0xff] }
  0xc2   : > { %3910 = vmatmul.msk.f32.gmra.mxu1 %vm298_vm1, %v4828_v24  ;;  %5932 = vst [vmem:[#allocation13_spill] sm:$0xff] %v4868_v3 }
  0xc3   : > { %v4872_v38 = vpop.f32.mrf.mxu1 }
  0xc6   : > { %v4880_v39 = vpop.f32.mrf.mxu2 }
  0xc7   : > { %4011 = vmatmul.msk.f32.gmra.mxu0 %vm298_vm1, %v4854_v32 }
  0xc8   : > { %3943 = vmatmul.msk.f32.gmra.mxu2 %vm298_vm1, %v4856_v33 }
  0xc9   : > { %3977 = vmatmul.msk.f32.gmra.mxu3 %vm298_vm1, %v4584_v15  ;;  %v4882_v15 = vpop.f32.mrf.mxu3 }
  0xca   : > { %3911 = vmatmul.msk.f32.gmra.mxu1 %vm298_vm1, %v4840_v27  ;;  %5933 = vst [vmem:[#allocation14_spill] sm:$0xff] %v4882_v15  ;;  %v4970_v15 = vld [vmem:[#allocation2 + $0x9a] sm:$0xff] }
  0xcb   : > { %5948 = vst [vmem:[#allocation29_spill] sm:$0xff] %v4970_v15 }
  0xcf   : > { %4012 = vmatmul.msk.f32.gmra.mxu0 %vm298_vm1, %v4868_v3 }
  0xd0   : > { %3944 = vmatmul.msk.f32.gmra.mxu2 %vm298_vm1, %v4870_v36 }
  0xd1   : > { %3978 = vmatmul.msk.f32.gmra.mxu3 %vm298_vm1, %v4639_v30 }
  0xd2   : > { %3912 = vmatmul.msk.f32.gmra.mxu1 %vm298_vm1, %v4854_v32  ;;  %v5037_v32 = vld [vmem:[#allocation2 + $0xe1] sm:$0xff] }
  0xd7   : > { %v4892_v44 = vpop.f32.mrf.mxu1  ;;  %4013 = vmatmul.msk.f32.gmra.mxu0 %vm298_vm1, %v4888_v42 }
  0xd8   : > { %3945 = vmatmul.msk.f32.gmra.mxu2 %vm298_vm1, %v4890_v43  ;;  %v5039_v43 = vld [vmem:[#allocation2 + $0xca] sm:$0xff] }
  0xd9   : > { %3979 = vmatmul.msk.f32.gmra.mxu3 %vm298_vm1, %v4661_v40 }
  0xda   : > { %3913 = vmatmul.msk.f32.gmra.mxu1 %vm298_vm1, %v4868_v3  ;;  %v5010_v3 = vld [vmem:[#allocation2 + $0xb2] sm:$0xff] }
  0xdb   : > { %v4902_v30 = vpop.f32.mrf.mxu2  ;;  %5955 = vst [vmem:[#allocation36_spill] sm:$0xff] %v5010_v3 }
  0xdc   : > { %v4904_v45 = vpop.f32.mrf.mxu3  ;;  %v4906_v46 = vpop.f32.mrf.mxu0 }
  0xdd   : > { %5936 = vst [vmem:[#allocation17_spill] sm:$0xff] %v4904_v45  ;;  %v4968_v45 = vld [vmem:[#allocation2 + $0xb1] sm:$0xff] }
  0xde   : > { %5947 = vst [vmem:[#allocation28_spill] sm:$0xff] %v4968_v45 }
  0xdf   : > { %v4912_v52 = vpop.f32.mrf.mxu1  ;;  %4014 = vmatmul.msk.f32.gmra.mxu0 %vm298_vm1, %v4908_v47 }
  0xe0   : > { %3946 = vmatmul.msk.f32.gmra.mxu2 %vm298_vm1, %v4910_v49 }
  0xe1   : > { %3980 = vmatmul.msk.f32.gmra.mxu3 %vm298_vm1, %v4692_v51 }
  0xe2   : > { %3914 = vmatmul.msk.f32.gmra.mxu1 %vm298_vm1, %v4888_v42  ;;  %v4990_v42 = vld [vmem:[#allocation2 + $0xaa] sm:$0xff] }
  0xe3   : > { %v4922_v40 = vpop.f32.mrf.mxu2  ;;  %5952 = vst [vmem:[#allocation33_spill] sm:$0xff] %v4990_v42 }
  0xe4   : > { %v4924_v57 = vpop.f32.mrf.mxu3  ;;  %v4926_v58 = vpop.f32.mrf.mxu0 }
  0xe5   : > { %5939 = vst [vmem:[#allocation20_spill] sm:$0xff] %v4924_v57 }
  0xe7   : > { %v4932_v9 = vpop.f32.mrf.mxu1  ;;  %4015 = vmatmul.msk.f32.gmra.mxu0 %vm298_vm1, %v4928_v59 }
  0xe8   : > { %3947 = vmatmul.msk.f32.gmra.mxu2 %vm298_vm1, %v4930_v0 }
  0xe9   : > { %3981 = vmatmul.msk.f32.gmra.mxu3 %vm298_vm1, %v4712_v56 }
  0xea   : > { %3915 = vmatmul.msk.f32.gmra.mxu1 %vm298_vm1, %v4908_v47 }
  0xeb   : > { %v4942_v51 = vpop.f32.mrf.mxu2 }
  0xec   : > { %v4944_v10 = vpop.f32.mrf.mxu3  ;;  %v4946_v11 = vpop.f32.mrf.mxu0 }
  0xed   : > { %5942 = vst [vmem:[#allocation23_spill] sm:$0xff] %v4944_v10 }
  0xef   : > { %v4952_v17 = vpop.f32.mrf.mxu1  ;;  %4016 = vmatmul.msk.f32.gmra.mxu0 %vm298_vm1, %v4948_v12 }
  0xf0   : > { %3948 = vmatmul.msk.f32.gmra.mxu2 %vm298_vm1, %v4950_v16  ;;  %v4988_v16 = vld [vmem:[#allocation2 + $0xc1] sm:$0xff] }
  0xf1   : > { %3982 = vmatmul.msk.f32.gmra.mxu3 %vm298_vm1, %v4740_v63  ;;  %5951 = vst [vmem:[#allocation32_spill] sm:$0xff] %v4988_v16 }
  0xf2   : > { %3916 = vmatmul.msk.f32.gmra.mxu1 %vm298_vm1, %v4928_v59 }
  0xf3   : > { %v4962_v56 = vpop.f32.mrf.mxu2 }
  0xf4   : > { %5945 = vst [vmem:[#allocation26_spill] sm:$0xff] %v4962_v56  ;;  %v4964_v10 = vpop.f32.mrf.mxu3  ;;  %v4966_v57 = vpop.f32.mrf.mxu0 }
  0xf5   : > { %5946 = vst [vmem:[#allocation27_spill] sm:$0xff] %v4964_v10 }
  0xf7   : > { %v4972_v47 = vpop.f32.mrf.mxu1  ;;  %4017 = vmatmul.msk.f32.gmra.mxu0 %vm298_vm1, %v4968_v45 }
  0xf8   : > { %3949 = vmatmul.msk.f32.gmra.mxu2 %vm298_vm1, %v4970_v15  ;;  %v5008_v15 = vld [vmem:[#allocation2 + $0xc9] sm:$0xff] }
  0xf9   : > { %3983 = vmatmul.msk.f32.gmra.mxu3 %vm298_vm1, %v4760_v5 }
  0xfa   : > { %3917 = vmatmul.msk.f32.gmra.mxu1 %vm298_vm1, %v4948_v12 }
  0xfb   : > { %v4982_v63 = vpop.f32.mrf.mxu2 }
  0xfc   : > { %5949 = vst [vmem:[#allocation30_spill] sm:$0xff] %v4982_v63  ;;  %v4984_v10 = vpop.f32.mrf.mxu3  ;;  %v4986_v59 = vpop.f32.mrf.mxu0 }
  0xfd   : > { %5950 = vst [vmem:[#allocation31_spill] sm:$0xff] %v4984_v10 }
  0xff   : > { %v4992_v0 = vpop.f32.mrf.mxu1  ;;  %4018 = vmatmul.msk.f32.gmra.mxu0 %vm298_vm1, %v4988_v16 }
 0x100   : > { %3950 = vmatmul.msk.f32.gmra.mxu2 %vm298_vm1, %v4990_v42  ;;  %v5024_v42 = vld [vmem:[#allocation2 + $0xd9] sm:$0xff] }
 0x101   : > { %3984 = vmatmul.msk.f32.gmra.mxu3 %vm298_vm1, %v4570_v13 }
 0x102   : > { %3918 = vmatmul.msk.f32.gmra.mxu1 %vm298_vm1, %v4968_v45 }
 0x103   : > { %v5002_v5 = vpop.f32.mrf.mxu2 }
 0x104   : > { %5953 = vst [vmem:[#allocation34_spill] sm:$0xff] %v5002_v5  ;;  %v5004_v10 = vpop.f32.mrf.mxu3  ;;  %v5006_v12 = vpop.f32.mrf.mxu0  ;;  %v5026_v5 = vld [vmem:[#allocation2 + $0xc2] sm:$0xff] }
 0x105   : > { %5954 = vst [vmem:[#allocation35_spill] sm:$0xff] %v5004_v10 }
 0x106   : > { %5958 = vst [vmem:[#allocation39_spill] sm:$0xff] %v5026_v5 }
 0x107   : > { %v942_v49 = vpop.f32.mrf.mxu1  ;;  %4019 = vmatmul.msk.f32.gmra.mxu0 %vm298_vm1, %v5008_v15 }
 0x108   : > { %3951 = vmatmul.msk.f32.gmra.mxu2 %vm298_vm1, %v5010_v3 }
 0x109   : > { %3985 = vmatmul.msk.f32.gmra.mxu3 %vm298_vm1, %v4627_v26  ;;  %v1038_v26 = vadd.f32 %v942_v49, %v4862_v34 }
 0x10a   : > { %3919 = vmatmul.msk.f32.gmra.mxu1 %vm298_vm1, %v4988_v16 }
 0x10b   : > { %v5020_v13 = vpop.f32.mrf.mxu2 }
 0x10c   : > { %5956 = vst [vmem:[#allocation37_spill] sm:$0xff] %v5020_v13  ;;  %v5022_v10 = vpop.f32.mrf.mxu3  ;;  %v1966_v45 = vpop.f32.mrf.mxu0 }
 0x10d   : > { %5957 = vst [vmem:[#allocation38_spill] sm:$0xff] %v5022_v10 }
 0x10f   : > { %v945_v63 = vpop.f32.mrf.mxu1  ;;  %4020 = vmatmul.msk.f32.gmra.mxu0 %vm298_vm1, %v5024_v42 }
 0x110   : > { %3952 = vmatmul.msk.f32.gmra.mxu2 %vm298_vm1, %v5026_v5 }
 0x111   : > { %3986 = vmatmul.msk.f32.gmra.mxu3 %vm298_vm1, %v4651_v35  ;;  %v1039_v35 = vadd.f32 %v945_v63, %v4886_v41 }
 0x112   : > { %3920 = vmatmul.msk.f32.gmra.mxu1 %vm298_vm1, %v5008_v15 }
 0x113   : > { %v1283_v10 = vpop.f32.mrf.mxu2 }
 0x114   : > { %v1379_v16 = vadd.f32 %v1283_v10, %v1038_v26  ;;  %v1625_v3 = vpop.f32.mrf.mxu3  ;;  %v1969_v13 = vpop.f32.mrf.mxu0  ;;  %v5054_v26 = vld [vmem:[#allocation2 + $0xda] sm:$0xff] }
 0x116   : > { %v1721_v56 = vadd.f32 %v1625_v3, %v1379_v16  ;;  %v5052_v16 = vld [vmem:[#allocation2 + $0xf1] sm:$0xff] }
 0x117   : > { %v948_v27 = vpop.f32.mrf.mxu1  ;;  %4021 = vmatmul.msk.f32.gmra.mxu0 %vm298_vm1, %v5037_v32 }
 0x118   : > { %v5043_v5 = vadd.f32 %v1966_v45, %v1721_v56  ;;  %3953 = vmatmul.msk.f32.gmra.mxu2 %vm298_vm1, %v5039_v43 }
 0x119   : > { %3987 = vmatmul.msk.f32.gmra.mxu3 %vm298_vm1, %v4685_v48  ;;  %v1040_v48 = vadd.f32 %v948_v27, %v4906_v46 }
 0x11a   : > { %5959 = vst [vmem:[#allocation40_spill] sm:$0xff] %v5043_v5  ;;  %3921 = vmatmul.msk.f32.gmra.mxu1 %vm298_vm1, %v5024_v42 }
 0x11b   : > { %v1286_v34 = vpop.f32.mrf.mxu2 }
 0x11c   : > { %v1380_v49 = vadd.f32 %v1286_v34, %v1039_v35  ;;  %v1628_v3 = vpop.f32.mrf.mxu3  ;;  %v1972_v10 = vpop.f32.mrf.mxu0 }
 0x11e   : > { %v1722_v45 = vadd.f32 %v1628_v3, %v1380_v49  ;;  %v5067_v49 = vld [vmem:[#allocation2 + $0xf9] sm:$0xff]  ;;  %v5069_v3 = vld [vmem:[#allocation2 + $0xe2] sm:$0xff] }
 0x11f   : > { %v951_v56 = vpop.f32.mrf.mxu1  ;;  %4022 = vmatmul.msk.f32.gmra.mxu0 %vm298_vm1, %v5052_v16 }
 0x120   : > { %v5058_v5 = vadd.f32 %v1969_v13, %v1722_v45  ;;  %3954 = vmatmul.msk.f32.gmra.mxu2 %vm298_vm1, %v5054_v26 }
 0x121   : > { %3988 = vmatmul.msk.f32.gmra.mxu3 %vm298_vm1, %v4708_v54  ;;  %v1041_v54 = vadd.f32 %v951_v56, %v4926_v58 }
 0x122   : > { %5960 = vst [vmem:[#allocation41_spill] sm:$0xff] %v5058_v5  ;;  %3922 = vmatmul.msk.f32.gmra.mxu1 %vm298_vm1, %v5037_v32 }
 0x123   : > { %v1289_v41 = vpop.f32.mrf.mxu2 }
 0x124   : > { %v1381_v63 = vadd.f32 %v1289_v41, %v1040_v48  ;;  %v1631_v35 = vpop.f32.mrf.mxu3  ;;  %v1975_v34 = vpop.f32.mrf.mxu0 }
 0x126   : > { %v1723_v13 = vadd.f32 %v1631_v35, %v1381_v63  ;;  %v5082_v63 = vld [vmem:[#allocation2 + $0x109] sm:$0xff]  ;;  %v5084_v35 = vld [vmem:[#allocation2 + $0xf2] sm:$0xff] }
 0x127   : > { %v954_v45 = vpop.f32.mrf.mxu1  ;;  %4023 = vmatmul.msk.f32.gmra.mxu0 %vm298_vm1, %v5067_v49 }
 0x128   : > { %v5073_v5 = vadd.f32 %v1972_v10, %v1723_v13  ;;  %3955 = vmatmul.msk.f32.gmra.mxu2 %vm298_vm1, %v5069_v3 }
 0x129   : > { %3989 = vmatmul.msk.f32.gmra.mxu3 %vm298_vm1, %v4736_v61  ;;  %v1042_v61 = vadd.f32 %v954_v45, %v4946_v11 }
 0x12a   : > { %5961 = vst [vmem:[#allocation42_spill] sm:$0xff] %v5073_v5  ;;  %3923 = vmatmul.msk.f32.gmra.mxu1 %vm298_vm1, %v5052_v16 }
 0x12b   : > { %v1292_v27 = vpop.f32.mrf.mxu2 }
 0x12c   : > { %v1382_v46 = vadd.f32 %v1292_v27, %v1041_v54  ;;  %v1634_v48 = vpop.f32.mrf.mxu3  ;;  %v1978_v41 = vpop.f32.mrf.mxu0 }
 0x12e   : > { %v1724_v10 = vadd.f32 %v1634_v48, %v1382_v46  ;;  %v5097_v46 = vld [vmem:[#allocation2 + $0x111] sm:$0xff]  ;;  %v5099_v48 = vld [vmem:[#allocation2 + $0xfa] sm:$0xff] }
 0x12f   : > { %v957_v13 = vpop.f32.mrf.mxu1  ;;  %4024 = vmatmul.msk.f32.gmra.mxu0 %vm298_vm1, %v5082_v63 }
 0x130   : > { %v5088_v5 = vadd.f32 %v1975_v34, %v1724_v10  ;;  %3956 = vmatmul.msk.f32.gmra.mxu2 %vm298_vm1, %v5084_v35 }
 0x131   : > { %3990 = vmatmul.msk.f32.gmra.mxu3 %vm298_vm1, %v4756_v2  ;;  %v1043_v2 = vadd.f32 %v957_v13, %v4966_v57 }
 0x132   : > { %5962 = vst [vmem:[#allocation43_spill] sm:$0xff] %v5088_v5  ;;  %3924 = vmatmul.msk.f32.gmra.mxu1 %vm298_vm1, %v5067_v49 }
 0x133   : > { %v1295_v58 = vpop.f32.mrf.mxu2 }
 0x134   : > { %v1383_v56 = vadd.f32 %v1295_v58, %v1042_v61  ;;  %v1637_v54 = vpop.f32.mrf.mxu3  ;;  %v1981_v27 = vpop.f32.mrf.mxu0 }
 0x136   : > { %v1725_v34 = vadd.f32 %v1637_v54, %v1383_v56  ;;  %v5112_v56 = vld [vmem:[#allocation2 + $0x121] sm:$0xff]  ;;  %v5114_v54 = vld [vmem:[#allocation2 + $0x10a] sm:$0xff] }
 0x137   : > { %v960_v10 = vpop.f32.mrf.mxu1  ;;  %4025 = vmatmul.msk.f32.gmra.mxu0 %vm298_vm1, %v5097_v46 }
 0x138   : > { %v5103_v5 = vadd.f32 %v1978_v41, %v1725_v34  ;;  %3957 = vmatmul.msk.f32.gmra.mxu2 %vm298_vm1, %v5099_v48 }
 0x139   : > { %3991 = vmatmul.msk.f32.gmra.mxu3 %vm298_vm1, %v4772_v7  ;;  %v1044_v7 = vadd.f32 %v960_v10, %v4986_v59 }
 0x13a   : > { %5963 = vst [vmem:[#allocation44_spill] sm:$0xff] %v5103_v5  ;;  %3925 = vmatmul.msk.f32.gmra.mxu1 %vm298_vm1, %v5082_v63 }
 0x13b   : > { %v1298_v11 = vpop.f32.mrf.mxu2 }
 0x13c   : > { %v1384_v45 = vadd.f32 %v1298_v11, %v1043_v2  ;;  %v1640_v61 = vpop.f32.mrf.mxu3  ;;  %v1984_v58 = vpop.f32.mrf.mxu0 }
 0x13e   : > { %v1726_v41 = vadd.f32 %v1640_v61, %v1384_v45  ;;  %v5127_v45 = vld [vmem:[#allocation2 + $0x129] sm:$0xff]  ;;  %v5129_v61 = vld [vmem:[#allocation2 + $0x112] sm:$0xff] }
 0x13f   : > { %v963_v34 = vpop.f32.mrf.mxu1  ;;  %4026 = vmatmul.msk.f32.gmra.mxu0 %vm298_vm1, %v5112_v56 }
 0x140   : > { %v5118_v5 = vadd.f32 %v1981_v27, %v1726_v41  ;;  %3958 = vmatmul.msk.f32.gmra.mxu2 %vm298_vm1, %v5114_v54 }
 0x141   : > { %3992 = vmatmul.msk.f32.gmra.mxu3 %vm298_vm1, %v4576_v14  ;;  %v1045_v14 = vadd.f32 %v963_v34, %v5006_v12 }
 0x142   : > { %5964 = vst [vmem:[#allocation45_spill] sm:$0xff] %v5118_v5  ;;  %3926 = vmatmul.msk.f32.gmra.mxu1 %vm298_vm1, %v5097_v46 }
 0x143   : > { %v1301_v57 = vpop.f32.mrf.mxu2 }
 0x144   : > { %v1385_v13 = vadd.f32 %v1301_v57, %v1044_v7  ;;  %v1643_v2 = vpop.f32.mrf.mxu3  ;;  %v1987_v11 = vpop.f32.mrf.mxu0 }
 0x146   : > { %v1727_v27 = vadd.f32 %v1643_v2, %v1385_v13  ;;  %v5142_v13 = vld [vmem:[#allocation2 + $0x139] sm:$0xff]  ;;  %v5144_v2 = vld [vmem:[#allocation2 + $0x122] sm:$0xff] }
 0x147   : > { %v966_v41 = vpop.f32.mrf.mxu1  ;;  %4027 = vmatmul.msk.f32.gmra.mxu0 %vm298_vm1, %v5127_v45 }
 0x148   : > { %v5133_v5 = vadd.f32 %v1984_v58, %v1727_v27  ;;  %3959 = vmatmul.msk.f32.gmra.mxu2 %vm298_vm1, %v5129_v61 }
 0x149   : > { %3993 = vmatmul.msk.f32.gmra.mxu3 %vm298_vm1, %v4633_v28  ;;  %v1046_v28 = vadd.f32 %v966_v41, %v4852_v31 }
 0x14a   : > { %5965 = vst [vmem:[#allocation46_spill] sm:$0xff] %v5133_v5  ;;  %3927 = vmatmul.msk.f32.gmra.mxu1 %vm298_vm1, %v5112_v56 }
 0x14b   : > { %v1304_v59 = vpop.f32.mrf.mxu2 }
 0x14c   : > { %v1386_v10 = vadd.f32 %v1304_v59, %v1045_v14  ;;  %v1646_v7 = vpop.f32.mrf.mxu3  ;;  %v1990_v57 = vpop.f32.mrf.mxu0 }
 0x14e   : > { %v1728_v58 = vadd.f32 %v1646_v7, %v1386_v10  ;;  %v5157_v10 = vld [vmem:[#allocation2 + $0x141] sm:$0xff] }
 0x14f   : > { %v969_v27 = vpop.f32.mrf.mxu1  ;;  %4028 = vmatmul.msk.f32.gmra.mxu0 %vm298_vm1, %v5142_v13 }
 0x150   : > { %v5148_v5 = vadd.f32 %v1987_v11, %v1728_v58  ;;  %3960 = vmatmul.msk.f32.gmra.mxu2 %vm298_vm1, %v5144_v2  ;;  %v5159_v11 = vld [vmem:[#allocation2 + $0x12a] sm:$0xff]  ;;  %v1047_v31 = vadd.f32 %v969_v27, %v4872_v38  ;;  %v297_v38 = vld [vmem:[%s4466_s13 + $0xf8] sm:$0xff] }
 0x151   : > { %3994 = vmatmul.msk.f32.gmra.mxu3 %vm298_vm1, %v4655_v37  ;;  %v296_v37 = vld [vmem:[%s4466_s13 + $0xf0] sm:$0xff]  ;;  %386 = vst.msk [vmem:[#allocation2 + $0x189] sm:$0xff] %vm298_vm1, %v297_v38  ;;  %s5442_s13 = sand.u32 1, %s4348_s22  }
 0x152   : > { %5966 = vst [vmem:[#allocation47_spill] sm:$0xff] %v5148_v5  ;;  %3928 = vmatmul.msk.f32.gmra.mxu1 %vm298_vm1, %v5127_v45  ;;  %s3866_s15 = sshll.u32 %s5442_s13, 8  ;;  %s3698_s7 = scalar_lea.sflag [#allocation5], %s5442_s13 }
 0x153   : > { %v1307_v12 = vpop.f32.mrf.mxu2  ;;  %385 = vst.msk [vmem:[#allocation2 + $0x181] sm:$0xff] %vm298_vm1, %v296_v37  ;;  %s5456_s16 = scalar_lea.vmem [#allocation4], %s3866_s15 }
 0x154   : > { %v1387_v34 = vadd.f32 %v1307_v12, %v1046_v28  ;;  %v1649_v14 = vpop.f32.mrf.mxu3  ;;  %v1993_v59 = vpop.f32.mrf.mxu0  ;;  %s3718_s26 = sshll.u32 %s5456_s16, 4  ;;  %s3719_s26 = int_to_ptr.vmem [resolvable:$true] %s3718_s26 }
 0x156   : > { %v1729_v7 = vadd.f32 %v1649_v14, %v1387_v34  ;;  %v5174_v34 = vld [vmem:[#allocation2 + $0x151] sm:$0xff]  ;;  %v5176_v14 = vld [vmem:[#allocation2 + $0x13a] sm:$0xff] }
 0x157   : > { %v972_v58 = vpop.f32.mrf.mxu1  ;;  %4029 = vmatmul.msk.f32.gmra.mxu0 %vm298_vm1, %v5157_v10 }
 0x158   : > { %v5163_v5 = vadd.f32 %v1990_v57, %v1729_v7  ;;  %3961 = vmatmul.msk.f32.gmra.mxu2 %vm298_vm1, %v5159_v11  ;;  %v1048_v27 = vadd.f32 %v972_v58, %v4892_v44 }
 0x159   : > { %3995 = vmatmul.msk.f32.gmra.mxu3 %vm298_vm1, %v4689_v50 }
 0x15a   : > { %5967 = vst [vmem:[#allocation48_spill] sm:$0xff] %v5163_v5  ;;  %3929 = vmatmul.msk.f32.gmra.mxu1 %vm298_vm1, %v5142_v13 }
 0x15b   : > { %v1310_v41 = vpop.f32.mrf.mxu2 }
 0x15c   : > { %v1388_v28 = vadd.f32 %v1310_v41, %v1047_v31  ;;  %v1652_v12 = vpop.f32.mrf.mxu3  ;;  %v1996_v57 = vpop.f32.mrf.mxu0 }
 0x15e   : > { %v1730_v7 = vadd.f32 %v1652_v12, %v1388_v28  ;;  %v5193_v12 = vld [vmem:[#allocation2 + $0x142] sm:$0xff] }
 0x15f   : > { %v975_v5 = vpop.f32.mrf.mxu1  ;;  %4030 = vmatmul.msk.f32.gmra.mxu0 %vm298_vm1, %v5174_v34 }
 0x160   : > { %v5180_v50 = vadd.f32 %v1993_v59, %v1730_v7  ;;  %3962 = vmatmul.msk.f32.gmra.mxu2 %vm298_vm1, %v5176_v14  ;;  %v5191_v59 = vld [vmem:[#allocation2 + $0x159] sm:$0xff]  ;;  %v1049_v44 = vadd.f32 %v975_v5, %v4912_v52 }
 0x161   : > { %3996 = vmatmul.msk.f32.gmra.mxu3 %vm298_vm1, %v4710_v55 }
 0x162   : > { %5968 = vst [vmem:[#allocation49_spill] sm:$0xff] %v5180_v50  ;;  %3930 = vmatmul.msk.f32.gmra.mxu1 %vm298_vm1, %v5157_v10 }
 0x163   : > { %v1313_v37 = vpop.f32.mrf.mxu2 }
 0x164   : > { %v1389_v31 = vadd.f32 %v1313_v37, %v1048_v27  ;;  %v1655_v41 = vpop.f32.mrf.mxu3  ;;  %v1999_v28 = vpop.f32.mrf.mxu0 }
 0x166   : > { %v1731_v7 = vadd.f32 %v1655_v41, %v1389_v31  ;;  %v5206_v31 = vld [vmem:[#allocation2 + $0x169] sm:$0xff]  ;;  %v5208_v41 = vld [vmem:[#allocation2 + $0x152] sm:$0xff] }
 0x167   : > { %v978_v50 = vpop.f32.mrf.mxu1  ;;  %4031 = vmatmul.msk.f32.gmra.mxu0 %vm298_vm1, %v5191_v59 }
 0x168   : > { %v5197_v55 = vadd.f32 %v1996_v57, %v1731_v7  ;;  %3963 = vmatmul.msk.f32.gmra.mxu2 %vm298_vm1, %v5193_v12 }
 0x169   : > { %3997 = vmatmul.msk.f32.gmra.mxu3 %vm298_vm1, %v4738_v62  ;;  %v1050_v62 = vadd.f32 %v978_v50, %v4932_v9 }
 0x16a   : > { %5969 = vst [vmem:[#allocation50_spill] sm:$0xff] %v5197_v55  ;;  %3931 = vmatmul.msk.f32.gmra.mxu1 %vm298_vm1, %v5174_v34 }
 0x16b   : > { %v1316_v58 = vpop.f32.mrf.mxu2 }
 0x16c   : > { %v1390_v38 = vadd.f32 %v1316_v58, %v1049_v44  ;;  %v1658_v27 = vpop.f32.mrf.mxu3  ;;  %v2002_v37 = vpop.f32.mrf.mxu0 }
 0x16e   : > { %v1732_v57 = vadd.f32 %v1658_v27, %v1390_v38  ;;  %v5221_v38 = vld [vmem:[#allocation2 + $0x171] sm:$0xff]  ;;  %v5223_v27 = vld [vmem:[#allocation2 + $0x15a] sm:$0xff] }
 0x16f   : > { %v981_v7 = vpop.f32.mrf.mxu1  ;;  %4032 = vmatmul.msk.f32.gmra.mxu0 %vm298_vm1, %v5206_v31  ;;  %5971 = vst [vmem:[#allocation52_spill] sm:$0xff] %v5221_v38 }
 0x170   : > { %v5212_v55 = vadd.f32 %v1999_v28, %v1732_v57  ;;  %3964 = vmatmul.msk.f32.gmra.mxu2 %vm298_vm1, %v5208_v41 }
 0x171   : > { %3998 = vmatmul.msk.f32.gmra.mxu3 %vm298_vm1, %v4758_v4  ;;  %v1051_v4 = vadd.f32 %v981_v7, %v4952_v17 }
 0x172   : > { %5970 = vst [vmem:[#allocation51_spill] sm:$0xff] %v5212_v55  ;;  %3932 = vmatmul.msk.f32.gmra.mxu1 %vm298_vm1, %v5191_v59 }
 0x173   : > { %v1319_v52 = vpop.f32.mrf.mxu2 }
 0x174   : > { %v1391_v5 = vadd.f32 %v1319_v52, %v1050_v62  ;;  %v1661_v44 = vpop.f32.mrf.mxu3  ;;  %v2005_v58 = vpop.f32.mrf.mxu0 }
 0x176   : > { %v1733_v28 = vadd.f32 %v1661_v44, %v1391_v5  ;;  %v5236_v5 = vld [vmem:[#allocation2 + $0x181] sm:$0xff]  ;;  %v5238_v44 = vld [vmem:[#allocation2 + $0x16a] sm:$0xff] }
 0x177   : > { %v984_v57 = vpop.f32.mrf.mxu1  ;;  %4033 = vmatmul.msk.f32.gmra.mxu0 %vm298_vm1, %v5221_v38  ;;  %5973 = vst [vmem:[#allocation54_spill] sm:$0xff] %v5236_v5 }
 0x178   : > { %v5227_v55 = vadd.f32 %v2002_v37, %v1733_v28  ;;  %3965 = vmatmul.msk.f32.gmra.mxu2 %vm298_vm1, %v5223_v27  ;;  %v5240_v28 = vld [vmem:[#allocation2 + $0x180] sm:$0xff]  ;;  %v1052_v17 = vadd.f32 %v984_v57, %v4972_v47 }
 0x179   : > { %3999 = vmatmul.msk.f32.gmra.mxu3 %vm298_vm1, %v4774_v8  ;;  %5974 = vst [vmem:[#allocation55_spill] sm:$0xff] %v5240_v28 }
 0x17a   : > { %5972 = vst [vmem:[#allocation53_spill] sm:$0xff] %v5227_v55  ;;  %3933 = vmatmul.msk.f32.gmra.mxu1 %vm298_vm1, %v5206_v31 }
 0x17b   : > { %v1322_v9 = vpop.f32.mrf.mxu2 }
 0x17c   : > { %v1392_v50 = vadd.f32 %v1322_v9, %v1051_v4  ;;  %v1664_v62 = vpop.f32.mrf.mxu3  ;;  %v2008_v52 = vpop.f32.mrf.mxu0 }
 0x17e   : > { %v1734_v37 = vadd.f32 %v1664_v62, %v1392_v50  ;;  %v5253_v62 = vld [vmem:[#allocation2 + $0x189] sm:$0xff] }
 0x17f   : > { %v987_v55 = vpop.f32.mrf.mxu1  ;;  %4034 = vmatmul.msk.f32.gmra.mxu0 %vm298_vm1, %v5236_v5  ;;  %v5255_v5 = vld [vmem:[#allocation2 + $0x172] sm:$0xff] }
 0x180   : > { %v5244_v8 = vadd.f32 %v2005_v58, %v1734_v37  ;;  %3966 = vmatmul.msk.f32.gmra.mxu2 %vm298_vm1, %v5238_v44  ;;  %v5257_v37 = vld [vmem:[#allocation2 + $0x188] sm:$0xff]  ;;  %v1053_v47 = vadd.f32 %v987_v55, %v4992_v0 }
 0x181   : > { %4000 = vmatmul.msk.f32.gmra.mxu3 %vm298_vm1, %v5240_v28 }
 0x182   : > { %5975 = vst [vmem:[#allocation56_spill] sm:$0xff] %v5244_v8  ;;  %3934 = vmatmul.msk.f32.gmra.mxu1 %vm298_vm1, %v5221_v38 }
 0x183   : > { %v1325_v7 = vpop.f32.mrf.mxu2 }
 0x184   : > { %v1393_v4 = vadd.f32 %v1325_v7, %v1052_v17  ;;  %v1667_v9 = vpop.f32.mrf.mxu3  ;;  %v2011_v50 = vpop.f32.mrf.mxu0 }
 0x186   : > { %v1735_v58 = vadd.f32 %v1667_v9, %v1393_v4 }
 0x187   : > { %v990_v8 = vpop.f32.mrf.mxu1  ;;  %4035 = vmatmul.msk.f32.gmra.mxu0 %vm298_vm1, %v5253_v62 }
 0x188   : > { %v5261_v28 = vadd.f32 %v2008_v52, %v1735_v58  ;;  %3967 = vmatmul.msk.f32.gmra.mxu2 %vm298_vm1, %v5255_v5  ;;  %v1054_v0 = vadd.f32 %v990_v8, %v4880_v39 }
 0x189   : > { %4001 = vmatmul.msk.f32.gmra.mxu3 %vm298_vm1, %v5257_v37 }
 0x18a   : > { %4038 = vmatmul.msk.f32.vlgmr.msra.gmra.mxu1 %vm298_vm1, %v4795_v19 }
 0x18b   : > { %v1328_v57 = vpop.f32.mrf.mxu2 }
 0x18c   : > { %v1394_v17 = vadd.f32 %v1328_v57, %v1053_v47  ;;  %v1670_v7 = vpop.f32.mrf.mxu3  ;;  %v2014_v4 = vpop.f32.mrf.mxu0 }
 0x18e   : > { %v1736_v9 = vadd.f32 %v1670_v7, %v1394_v17 }
 0x18f   : > { %v993_v38 = vpop.f32.mrf.mxu1  ;;  %4140 = vmatmul.msk.f32.vlgmr.msra.gmra.mxu0 %vm298_vm1, %v4818_v23 }
 0x190   : > { %v5272_v52 = vadd.f32 %v2011_v50, %v1736_v9  ;;  %4072 = vmatmul.msk.f32.vlgmr.msra.gmra.mxu2 %vm298_vm1, %v4706_v53  ;;  %v1055_v53 = vadd.f32 %v993_v38, %v4902_v30 }
 0x191   : > { %4106 = vmatmul.msk.f32.vlgmr.msra.gmra.mxu3 %vm298_vm1, %v4793_v18 }
 0x192   : > { %4039 = vmatmul.msk.f32.gmra.mxu1 %vm298_vm1, %v4806_v21 }
 0x193   : > { %v1331_v19 = vpop.f32.mrf.mxu2 }
 0x194   : > { %v1395_v55 = vadd.f32 %v1331_v19, %v1054_v0  ;;  %v1673_v58 = vpop.f32.mrf.mxu3  ;;  %v2017_v47 = vpop.f32.mrf.mxu0 }
 0x196   : > { %v1737_v57 = vadd.f32 %v1673_v58, %v1395_v55 }
 0x197   : > { %v996_v17 = vpop.f32.mrf.mxu1  ;;  %4141 = vmatmul.msk.f32.gmra.mxu0 %vm298_vm1, %v4830_v25 }
 0x198   : > { %v5283_v50 = vadd.f32 %v2014_v4, %v1737_v57  ;;  %4073 = vmatmul.msk.f32.gmra.mxu2 %vm298_vm1, %v4734_v60  ;;  %v1056_v60 = vadd.f32 %v996_v17, %v4922_v40 }
 0x199   : > { %4107 = vmatmul.msk.f32.gmra.mxu3 %vm298_vm1, %v4804_v20 }
 0x19a   : > { %4040 = vmatmul.msk.f32.gmra.mxu1 %vm298_vm1, %v4818_v23 }
 0x19b   : > { %v1334_v18 = vpop.f32.mrf.mxu2 }
 0x19c   : > { %v1396_v21 = vadd.f32 %v1334_v18, %v1055_v53  ;;  %v1676_v39 = vpop.f32.mrf.mxu3  ;;  %v2020_v8 = vpop.f32.mrf.mxu0 }
 0x19e   : > { %v1738_v7 = vadd.f32 %v1676_v39, %v1396_v21 }
 0x19f   : > { %v999_v9 = vpop.f32.mrf.mxu1  ;;  %4142 = vmatmul.msk.f32.gmra.mxu0 %vm298_vm1, %v4842_v29 }
 0x1a0   : > { %v5294_v4 = vadd.f32 %v2017_v47, %v1738_v7  ;;  %4074 = vmatmul.msk.f32.gmra.mxu2 %vm298_vm1, %v4754_v1  ;;  %v1057_v1 = vadd.f32 %v999_v9, %v4942_v51  ;;  %v2472_v47 = vld [vmem:[#allocation2 + $0x60] sm:$0xff] }
 0x1a1   : > { %4108 = vmatmul.msk.f32.gmra.mxu3 %vm298_vm1, %v4816_v22 }
 0x1a2   : > { %4041 = vmatmul.msk.f32.gmra.mxu1 %vm298_vm1, %v4830_v25 }
 0x1a3   : > { %v1337_v20 = vpop.f32.mrf.mxu2 }
 0x1a4   : > { %v1397_v23 = vadd.f32 %v1337_v20, %v1056_v60  ;;  %v1679_v30 = vpop.f32.mrf.mxu3  ;;  %v2023_v38 = vpop.f32.mrf.mxu0  ;;  %v5978_v60 = vld [vmem:[#allocation16_spill] sm:$0xff] }
 0x1a6   : > { %v1739_v0 = vadd.f32 %v1679_v30, %v1397_v23  ;;  %v5979_v23 = vld [vmem:[#allocation12_spill] sm:$0xff]  ;;  %v5980_v30 = vld [vmem:[#allocation30_spill] sm:$0xff] }
 0x1a7   : > { %v1002_v19 = vpop.f32.mrf.mxu1  ;;  %4143 = vmatmul.msk.f32.gmra.mxu0 %vm298_vm1, %v4856_v33 }
 0x1a8   : > { %v5305_v55 = vadd.f32 %v2020_v8, %v1739_v0  ;;  %4075 = vmatmul.msk.f32.gmra.mxu2 %vm298_vm1, %v4770_v6  ;;  %v5976_v6 = vld [vmem:[#allocation11_spill] sm:$0xff]  ;;  %v2473_v8 = vld [vmem:[#allocation2 + $0x68] sm:$0xff] }
 0x1a9   : > { %4109 = vmatmul.msk.f32.gmra.mxu3 %vm298_vm1, %v4828_v24  ;;  %v5977_v24 = vld [vmem:[#allocation26_spill] sm:$0xff] }
 0x1aa   : > { %4042 = vmatmul.msk.f32.gmra.mxu1 %vm298_vm1, %v4842_v29  ;;  %v1058_v51 = vadd.f32 %v1002_v19, %v5977_v24 }
 0x1ab   : > { %v1340_v22 = vpop.f32.mrf.mxu2 }
 0x1ac   : > { %v1398_v25 = vadd.f32 %v1340_v22, %v1057_v1  ;;  %v1682_v40 = vpop.f32.mrf.mxu3  ;;  %v2026_v58 = vpop.f32.mrf.mxu0  ;;  %v2474_v22 = vld [vmem:[#allocation2 + $0x78] sm:$0xff] }
 0x1ae   : > { %v1740_v57 = vadd.f32 %v1682_v40, %v1398_v25 }
 0x1af   : > { %v1005_v17 = vpop.f32.mrf.mxu1  ;;  %4144 = vmatmul.msk.f32.gmra.mxu0 %vm298_vm1, %v4870_v36 }
 0x1b0   : > { %v5316_v53 = vadd.f32 %v2023_v38, %v1740_v57  ;;  %4076 = vmatmul.msk.f32.gmra.mxu2 %vm298_vm1, %v2472_v47  ;;  %v1059_v38 = vadd.f32 %v1005_v17, %v5980_v30  ;;  %v5981_v47 = vld [vmem:[#allocation19_spill] sm:$0xff]  ;;  %v5982_v57 = vld [vmem:[#allocation13_spill] sm:$0xff]  ;;  %v5983_v17 = vld [vmem:[#allocation34_spill] sm:$0xff] }
 0x1b1   : > { %4110 = vmatmul.msk.f32.gmra.mxu3 %vm298_vm1, %v5976_v6 }
 0x1b2   : > { %4043 = vmatmul.msk.f32.gmra.mxu1 %vm298_vm1, %v4856_v33 }
 0x1b3   : > { %v1343_v29 = vpop.f32.mrf.mxu2 }
 0x1b4   : > { %v1399_v18 = vadd.f32 %v1343_v29, %v1058_v51  ;;  %v1685_v21 = vpop.f32.mrf.mxu3  ;;  %v2029_v39 = vpop.f32.mrf.mxu0 }
 0x1b6   : > { %v1741_v7 = vadd.f32 %v1685_v21, %v1399_v18  ;;  %v2475_v18 = vld [vmem:[#allocation2 + $0x80] sm:$0xff] }
 0x1b7   : > { %v1008_v9 = vpop.f32.mrf.mxu1  ;;  %4145 = vmatmul.msk.f32.gmra.mxu0 %vm298_vm1, %v5978_v60 }
 0x1b8   : > { %v5326_v20 = vadd.f32 %v2026_v58, %v1741_v7  ;;  %4077 = vmatmul.msk.f32.gmra.mxu2 %vm298_vm1, %v2473_v8  ;;  %v1060_v6 = vadd.f32 %v1008_v9, %v5983_v17  ;;  %v5984_v7 = vld [vmem:[#allocation22_spill] sm:$0xff]  ;;  %v5986_v9 = vld [vmem:[#allocation37_spill] sm:$0xff] }
 0x1b9   : > { %4111 = vmatmul.msk.f32.gmra.mxu3 %vm298_vm1, %v5979_v23  ;;  %v5985_v23 = vld [vmem:[#allocation15_spill] sm:$0xff]  ;;  %v5988_v17 = vld [vmem:[#allocation18_spill] sm:$0xff] }
 0x1ba   : > { %4044 = vmatmul.msk.f32.gmra.mxu1 %vm298_vm1, %v4870_v36 }
 0x1bb   : > { %v1346_v33 = vpop.f32.mrf.mxu2 }
 0x1bc   : > { %v1400_v0 = vadd.f32 %v1346_v33, %v1059_v38  ;;  %v1688_v19 = vpop.f32.mrf.mxu3  ;;  %v2032_v1 = vpop.f32.mrf.mxu0 }
 0x1be   : > { %v1742_v25 = vadd.f32 %v1688_v19, %v1400_v0  ;;  %v2476_v19 = vld [vmem:[#allocation2 + $0x90] sm:$0xff] }
 0x1bf   : > { %v1011_v40 = vpop.f32.mrf.mxu1  ;;  %4146 = vmatmul.msk.f32.gmra.mxu0 %vm298_vm1, %v5981_v47 }
 0x1c0   : > { %v5336_v58 = vadd.f32 %v2029_v39, %v1742_v25  ;;  %4078 = vmatmul.msk.f32.gmra.mxu2 %vm298_vm1, %v2474_v22  ;;  %v1061_v30 = vadd.f32 %v1011_v40, %v5986_v9  ;;  %v5989_v40 = vld [vmem:[#allocation14_spill] sm:$0xff]  ;;  %v5990_v9 = vld [vmem:[#allocation29_spill] sm:$0xff] }
 0x1c1   : > { %4112 = vmatmul.msk.f32.gmra.mxu3 %vm298_vm1, %v5982_v57  ;;  %v5987_v57 = vld [vmem:[#allocation25_spill] sm:$0xff] }
 0x1c2   : > { %4045 = vmatmul.msk.f32.gmra.mxu1 %vm298_vm1, %v5978_v60 }
 0x1c3   : > { %v1349_v36 = vpop.f32.mrf.mxu2 }
 0x1c4   : > { %v1401_v24 = vadd.f32 %v1349_v36, %v1060_v6  ;;  %v1691_v51 = vpop.f32.mrf.mxu3  ;;  %v2035_v29 = vpop.f32.mrf.mxu0 }
 0x1c6   : > { %v1743_v21 = vadd.f32 %v1691_v51, %v1401_v24 }
 0x1c7   : > { %v1014_v8 = vpop.f32.mrf.mxu1  ;;  %4147 = vmatmul.msk.f32.gmra.mxu0 %vm298_vm1, %v5984_v7 }
 0x1c8   : > { %v5346_v39 = vadd.f32 %v2032_v1, %v1743_v21  ;;  %4079 = vmatmul.msk.f32.gmra.mxu2 %vm298_vm1, %v2475_v18  ;;  %v1062_v6 = vadd.f32 %v1014_v8, %v5989_v40  ;;  %v2477_v18 = vld [vmem:[#allocation2 + $0x98] sm:$0xff]  ;;  %v5992_v8 = vld [vmem:[#allocation17_spill] sm:$0xff] }
 0x1c9   : > { %4113 = vmatmul.msk.f32.gmra.mxu3 %vm298_vm1, %v5985_v23 }
 0x1ca   : > { %4046 = vmatmul.msk.f32.gmra.mxu1 %vm298_vm1, %v5981_v47 }
 0x1cb   : > { %v1352_v60 = vpop.f32.mrf.mxu2 }
 0x1cc   : > { %v1402_v38 = vadd.f32 %v1352_v60, %v1061_v30  ;;  %v1694_v33 = vpop.f32.mrf.mxu3  ;;  %v2038_v0 = vpop.f32.mrf.mxu0  ;;  %v5991_v30 = vld [vmem:[#allocation21_spill] sm:$0xff] }
 0x1ce   : > { %v1744_v22 = vadd.f32 %v1694_v33, %v1402_v38 }
 0x1cf   : > { %v1017_v25 = vpop.f32.mrf.mxu1  ;;  %4148 = vmatmul.msk.f32.gmra.mxu0 %vm298_vm1, %v5987_v57 }
 0x1d0   : > { %v5356_v1 = vadd.f32 %v2035_v29, %v1744_v22  ;;  %4080 = vmatmul.msk.f32.gmra.mxu2 %vm298_vm1, %v2476_v19  ;;  %v1063_v60 = vadd.f32 %v1017_v25, %v5992_v8  ;;  %v2478_v22 = vld [vmem:[#allocation2 + $0xa8] sm:$0xff]  ;;  %v5995_v25 = vld [vmem:[#allocation20_spill] sm:$0xff] }
 0x1d1   : > { %4114 = vmatmul.msk.f32.gmra.mxu3 %vm298_vm1, %v5988_v17 }
 0x1d2   : > { %4047 = vmatmul.msk.f32.gmra.mxu1 %vm298_vm1, %v5984_v7 }
 0x1d3   : > { %v1355_v47 = vpop.f32.mrf.mxu2 }
 0x1d4   : > { %v1403_v36 = vadd.f32 %v1355_v47, %v1062_v6  ;;  %v1697_v24 = vpop.f32.mrf.mxu3  ;;  %v2041_v51 = vpop.f32.mrf.mxu0  ;;  %v5993_v6 = vld [vmem:[#allocation33_spill] sm:$0xff]  ;;  %v5994_v47 = vld [vmem:[#allocation24_spill] sm:$0xff] }
 0x1d6   : > { %v1745_v21 = vadd.f32 %v1697_v24, %v1403_v36 }
 0x1d7   : > { %v1020_v23 = vpop.f32.mrf.mxu1  ;;  %4149 = vmatmul.msk.f32.gmra.mxu0 %vm298_vm1, %v5990_v9 }
 0x1d8   : > { %v5366_v29 = vadd.f32 %v2038_v0, %v1745_v21  ;;  %4081 = vmatmul.msk.f32.gmra.mxu2 %vm298_vm1, %v2477_v18  ;;  %v1064_v36 = vadd.f32 %v1020_v23, %v5995_v25  ;;  %v5998_v23 = vld [vmem:[#allocation23_spill] sm:$0xff]  ;;  %v2480_v25 = vld [vmem:[#allocation2 + $0xc0] sm:$0xff] }
 0x1d9   : > { %4115 = vmatmul.msk.f32.gmra.mxu3 %vm298_vm1, %v5991_v30  ;;  %v2479_v30 = vld [vmem:[#allocation2 + $0xb0] sm:$0xff] }
 0x1da   : > { %4048 = vmatmul.msk.f32.gmra.mxu1 %vm298_vm1, %v5987_v57 }
 0x1db   : > { %v1358_v7 = vpop.f32.mrf.mxu2 }
 0x1dc   : > { %v1404_v38 = vadd.f32 %v1358_v7, %v1063_v60  ;;  %v1700_v33 = vpop.f32.mrf.mxu3  ;;  %v2044_v19 = vpop.f32.mrf.mxu0  ;;  %v5996_v7 = vld [vmem:[#allocation36_spill] sm:$0xff] }
 0x1de   : > { %v1746_v17 = vadd.f32 %v1700_v33, %v1404_v38  ;;  %v5997_v38 = vld [vmem:[#allocation28_spill] sm:$0xff] }
 0x1df   : > { %v1023_v40 = vpop.f32.mrf.mxu1  ;;  %4150 = vmatmul.msk.f32.gmra.mxu0 %vm298_vm1, %v5993_v6 }
 0x1e0   : > { %v5376_v0 = vadd.f32 %v2041_v51, %v1746_v17  ;;  %4082 = vmatmul.msk.f32.gmra.mxu2 %vm298_vm1, %v2478_v22  ;;  %v1065_v33 = vadd.f32 %v1023_v40, %v5998_v23  ;;  %v6001_v40 = vld [vmem:[#allocation27_spill] sm:$0xff] }
 0x1e1   : > { %4116 = vmatmul.msk.f32.gmra.mxu3 %vm298_vm1, %v5994_v47 }
 0x1e2   : > { %4049 = vmatmul.msk.f32.gmra.mxu1 %vm298_vm1, %v5990_v9 }
 0x1e3   : > { %v1361_v57 = vpop.f32.mrf.mxu2 }
 0x1e4   : > { %v1405_v24 = vadd.f32 %v1361_v57, %v1064_v36  ;;  %v1703_v18 = vpop.f32.mrf.mxu3  ;;  %v2047_v21 = vpop.f32.mrf.mxu0 }
 0x1e6   : > { %v1747_v8 = vadd.f32 %v1703_v18, %v1405_v24  ;;  %v5999_v24 = vld [vmem:[#allocation39_spill] sm:$0xff]  ;;  %v6000_v18 = vld [vmem:[#allocation32_spill] sm:$0xff] }
 0x1e7   : > { %v1026_v60 = vpop.f32.mrf.mxu1  ;;  %4151 = vmatmul.msk.f32.gmra.mxu0 %vm298_vm1, %v5996_v7 }
 0x1e8   : > { %v5386_v51 = vadd.f32 %v2044_v19, %v1747_v8  ;;  %4083 = vmatmul.msk.f32.gmra.mxu2 %vm298_vm1, %v2479_v30  ;;  %v1066_v30 = vadd.f32 %v1026_v60, %v6001_v40  ;;  %v6002_v60 = vld [vmem:[#allocation31_spill] sm:$0xff] }
 0x1e9   : > { %4117 = vmatmul.msk.f32.gmra.mxu3 %vm298_vm1, %v5997_v38  ;;  %v2482_v40 = vld [vmem:[#allocation2 + $0xd8] sm:$0xff] }
 0x1ea   : > { %4050 = vmatmul.msk.f32.gmra.mxu1 %vm298_vm1, %v5993_v6 }
 0x1eb   : > { %v1364_v9 = vpop.f32.mrf.mxu2 }
 0x1ec   : > { %v1406_v22 = vadd.f32 %v1364_v9, %v1065_v33  ;;  %v1706_v17 = vpop.f32.mrf.mxu3  ;;  %v2050_v47 = vpop.f32.mrf.mxu0  ;;  %v2481_v33 = vld [vmem:[#allocation2 + $0xc8] sm:$0xff] }
 0x1ee   : > { %v1748_v36 = vadd.f32 %v1706_v17, %v1406_v22 }
 0x1ef   : > { %v1029_v57 = vpop.f32.mrf.mxu1  ;;  %4152 = vmatmul.msk.f32.gmra.mxu0 %vm298_vm1, %v5999_v24 }
 0x1f0   : > { %v5396_v19 = vadd.f32 %v2047_v21, %v1748_v36  ;;  %4084 = vmatmul.msk.f32.gmra.mxu2 %vm298_vm1, %v2480_v25  ;;  %v1067_v17 = vadd.f32 %v1029_v57, %v6002_v60 }
 0x1f1   : > { %4118 = vmatmul.msk.f32.gmra.mxu3 %vm298_vm1, %v6000_v18 }
 0x1f2   : > { %4051 = vmatmul.msk.f32.gmra.mxu1 %vm298_vm1, %v5996_v7 }
 0x1f3   : > { %v1367_v6 = vpop.f32.mrf.mxu2 }
 0x1f4   : > { %v1407_v8 = vadd.f32 %v1367_v6, %v1066_v30  ;;  %v1709_v38 = vpop.f32.mrf.mxu3  ;;  %v2053_v23 = vpop.f32.mrf.mxu0 }
 0x1f6   : > { %v1749_v9 = vadd.f32 %v1709_v38, %v1407_v8 }
 0x1f7   : > { %v1032_v22 = vpop.f32.mrf.mxu1  ;;  %4153 = vmatmul.msk.f32.gmra.mxu0 %vm298_vm1, %v5039_v43 }
 0x1f8   : > { %v5406_v21 = vadd.f32 %v2050_v47, %v1749_v9  ;;  %4085 = vmatmul.msk.f32.gmra.mxu2 %vm298_vm1, %v2481_v33  ;;  %v2483_v9 = vld [vmem:[#allocation2 + $0xe0] sm:$0xff] }
 0x1f9   : > { %4119 = vmatmul.msk.f32.gmra.mxu3 %vm298_vm1, %v5008_v15  ;;  %v6003_v15 = vld [vmem:[#allocation35_spill] sm:$0xff] }
 0x1fa   : > { %4052 = vmatmul.msk.f32.gmra.mxu1 %vm298_vm1, %v5999_v24  ;;  %v1068_v57 = vadd.f32 %v1032_v22, %v6003_v15 }
 0x1fb   : > { %v1370_v7 = vpop.f32.mrf.mxu2 }
 0x1fc   : > { %v1408_v25 = vadd.f32 %v1370_v7, %v1067_v17  ;;  %v1712_v36 = vpop.f32.mrf.mxu3  ;;  %v2056_v18 = vpop.f32.mrf.mxu0 }
 0x1fe   : > { %v1750_v30 = vadd.f32 %v1712_v36, %v1408_v25 }
 0x1ff   : > { %v1035_v6 = vpop.f32.mrf.mxu1  ;;  %4154 = vmatmul.msk.f32.gmra.mxu0 %vm298_vm1, %v5054_v26 }
 0x200   : > { %v5416_v47 = vadd.f32 %v2053_v23, %v1750_v30  ;;  %4086 = vmatmul.msk.f32.gmra.mxu2 %vm298_vm1, %v2482_v40  ;;  %v2484_v40 = vld [vmem:[#allocation2 + $0xf0] sm:$0xff] }
 0x201   : > { %4120 = vmatmul.msk.f32.gmra.mxu3 %vm298_vm1, %v5024_v42  ;;  %v6004_v42 = vld [vmem:[#allocation38_spill] sm:$0xff] }
 0x202   : > { %4053 = vmatmul.msk.f32.gmra.mxu1 %vm298_vm1, %v5039_v43  ;;  %v1069_v43 = vadd.f32 %v1035_v6, %v6004_v42 }
 0x203   : > { %v1373_v24 = vpop.f32.mrf.mxu2 }
 0x204   : > { %v1409_v8 = vadd.f32 %v1373_v24, %v1068_v57  ;;  %v1715_v38 = vpop.f32.mrf.mxu3  ;;  %v2059_v33 = vpop.f32.mrf.mxu0 }
 0x206   : > { %v1751_v60 = vadd.f32 %v1715_v38, %v1409_v8  ;;  %v2485_v38 = vld [vmem:[#allocation2 + $0xf8] sm:$0xff] }
 0x207   : > { %v2307_v17 = vpop.f32.mrf.mxu1  ;;  %4155 = vmatmul.msk.f32.gmra.mxu0 %vm298_vm1, %v5069_v3 }
 0x208   : > { %v5426_v23 = vadd.f32 %v2056_v18, %v1751_v60  ;;  %4087 = vmatmul.msk.f32.gmra.mxu2 %vm298_vm1, %v2483_v9  ;;  %v6006_v60 = vld [vmem:[#allocation41_spill] sm:$0xff] }
 0x209   : > { %4121 = vmatmul.msk.f32.gmra.mxu3 %vm298_vm1, %v5037_v32  ;;  %v6005_v32 = vld [vmem:[#allocation40_spill] sm:$0xff] }
 0x20a   : > { %4054 = vmatmul.msk.f32.gmra.mxu1 %vm298_vm1, %v5054_v26  ;;  %v2403_v26 = vadd.f32 %v2307_v17, %v6005_v32 }
 0x20b   : > { %v1376_v22 = vpop.f32.mrf.mxu2 }
 0x20c   : > { %v1410_v7 = vadd.f32 %v1376_v22, %v1069_v43  ;;  %v1718_v25 = vpop.f32.mrf.mxu3  ;;  %v3332_v36 = vpop.f32.mrf.mxu0 }
 0x20e   : > { %v1752_v30 = vadd.f32 %v1718_v25, %v1410_v7  ;;  %v2486_v7 = vld [vmem:[#allocation2 + $0x108] sm:$0xff] }
 0x20f   : > { %v2310_v15 = vpop.f32.mrf.mxu1  ;;  %4156 = vmatmul.msk.f32.gmra.mxu0 %vm298_vm1, %v5084_v35 }
 0x210   : > { %v5436_v18 = vadd.f32 %v2059_v33, %v1752_v30  ;;  %4088 = vmatmul.msk.f32.gmra.mxu2 %vm298_vm1, %v2484_v40  ;;  %v6007_v40 = vld [vmem:[#allocation42_spill] sm:$0xff] }
 0x211   : > { %4122 = vmatmul.msk.f32.gmra.mxu3 %vm298_vm1, %v5052_v16 }
 0x212   : > { %4055 = vmatmul.msk.f32.gmra.mxu1 %vm298_vm1, %v5069_v3  ;;  %v2404_v3 = vadd.f32 %v2310_v15, %v6006_v60 }
 0x213   : > { %v2650_v6 = vpop.f32.mrf.mxu2 }
 0x214   : > { %v2746_v57 = vadd.f32 %v2650_v6, %v2403_v26  ;;  %v2991_v24 = vpop.f32.mrf.mxu3  ;;  %v3335_v8 = vpop.f32.mrf.mxu0  ;;  %v2487_v6 = vld [vmem:[#allocation2 + $0x110] sm:$0xff] }
 0x216   : > { %v3087_v33 = vadd.f32 %v2991_v24, %v2746_v57 }
 0x217   : > { %v2313_v9 = vpop.f32.mrf.mxu1  ;;  %4157 = vmatmul.msk.f32.gmra.mxu0 %vm298_vm1, %v5099_v48 }
 0x218   : > { %v5450_v16 = vadd.f32 %v3332_v36, %v3087_v33  ;;  %4089 = vmatmul.msk.f32.gmra.mxu2 %vm298_vm1, %v2485_v38 }
 0x219   : > { %4123 = vmatmul.msk.f32.gmra.mxu3 %vm298_vm1, %v5067_v49 }
 0x21a   : > { %3524 = vst [vmem:[%s5456_s16] sm:$0xff] %v5450_v16  ;;  %4056 = vmatmul.msk.f32.gmra.mxu1 %vm298_vm1, %v5084_v35  ;;  %v2405_v35 = vadd.f32 %v2313_v9, %v6007_v40  ;;  %v2489_v40 = vld [vmem:[#allocation2 + $0x128] sm:$0xff] }
 0x21b   : > { %v2653_v17 = vpop.f32.mrf.mxu2 }
 0x21c   : > { %v2747_v42 = vadd.f32 %v2653_v17, %v2404_v3  ;;  %v2994_v43 = vpop.f32.mrf.mxu3  ;;  %v3338_v22 = vpop.f32.mrf.mxu0  ;;  %v2488_v3 = vld [vmem:[#allocation2 + $0x120] sm:$0xff] }
 0x21e   : > { %v3088_v25 = vadd.f32 %v2994_v43, %v2747_v42 }
 0x21f   : > { %v2316_v36 = vpop.f32.mrf.mxu1  ;;  %4158 = vmatmul.msk.f32.gmra.mxu0 %vm298_vm1, %v5114_v54 }
 0x220   : > { %v5464_v49 = vadd.f32 %v3335_v8, %v3088_v25  ;;  %4090 = vmatmul.msk.f32.gmra.mxu2 %vm298_vm1, %v2486_v7 }
 0x221   : > { %4124 = vmatmul.msk.f32.gmra.mxu3 %vm298_vm1, %v5082_v63  ;;  %v6008_v63 = vld [vmem:[#allocation43_spill] sm:$0xff] }
 0x222   : > { %3525 = vst [vmem:[%s5456_s16 + $0x8] sm:$0xff] %v5464_v49  ;;  %4057 = vmatmul.msk.f32.gmra.mxu1 %vm298_vm1, %v5099_v48  ;;  %v2406_v48 = vadd.f32 %v2316_v36, %v6008_v63 }
 0x223   : > { %v2656_v30 = vpop.f32.mrf.mxu2 }
 0x224   : > { %v2748_v15 = vadd.f32 %v2656_v30, %v2405_v35  ;;  %v2997_v32 = vpop.f32.mrf.mxu3  ;;  %v3341_v26 = vpop.f32.mrf.mxu0 }
 0x226   : > { %v3089_v57 = vadd.f32 %v2997_v32, %v2748_v15 }
 0x227   : > { %v2319_v24 = vpop.f32.mrf.mxu1  ;;  %4159 = vmatmul.msk.f32.gmra.mxu0 %vm298_vm1, %v5129_v61 }
 0x228   : > { %v5476_v8 = vadd.f32 %v3338_v22, %v3089_v57  ;;  %4091 = vmatmul.msk.f32.gmra.mxu2 %vm298_vm1, %v2487_v6 }
 0x229   : > { %4125 = vmatmul.msk.f32.gmra.mxu3 %vm298_vm1, %v5097_v46  ;;  %v6009_v46 = vld [vmem:[#allocation44_spill] sm:$0xff] }
 0x22a   : > { %3526 = vst [vmem:[%s5456_s16 + $0x10] sm:$0xff] %v5476_v8  ;;  %4058 = vmatmul.msk.f32.gmra.mxu1 %vm298_vm1, %v5114_v54  ;;  %v2407_v54 = vadd.f32 %v2319_v24, %v6009_v46  ;;  %v2490_v24 = vld [vmem:[#allocation2 + $0x138] sm:$0xff] }
 0x22b   : > { %v2659_v38 = vpop.f32.mrf.mxu2 }
 0x22c   : > { %v2749_v33 = vadd.f32 %v2659_v38, %v2406_v48  ;;  %v3000_v9 = vpop.f32.mrf.mxu3  ;;  %v3344_v60 = vpop.f32.mrf.mxu0 }
 0x22e   : > { %v3090_v17 = vadd.f32 %v3000_v9, %v2749_v33 }
 0x22f   : > { %v2322_v42 = vpop.f32.mrf.mxu1  ;;  %4160 = vmatmul.msk.f32.gmra.mxu0 %vm298_vm1, %v5144_v2 }
 0x230   : > { %v5488_v43 = vadd.f32 %v3341_v26, %v3090_v17  ;;  %4092 = vmatmul.msk.f32.gmra.mxu2 %vm298_vm1, %v2488_v3  ;;  %v2491_v17 = vld [vmem:[#allocation2 + $0x140] sm:$0xff] }
 0x231   : > { %4126 = vmatmul.msk.f32.gmra.mxu3 %vm298_vm1, %v5112_v56  ;;  %v6010_v56 = vld [vmem:[#allocation45_spill] sm:$0xff] }
 0x232   : > { %3527 = vst [vmem:[%s5456_s16 + $0x18] sm:$0xff] %v5488_v43  ;;  %4059 = vmatmul.msk.f32.gmra.mxu1 %vm298_vm1, %v5129_v61  ;;  %v2408_v61 = vadd.f32 %v2322_v42, %v6010_v56 }
 0x233   : > { %v2662_v22 = vpop.f32.mrf.mxu2 }
 0x234   : > { %v2750_v7 = vadd.f32 %v2662_v22, %v2407_v54  ;;  %v3003_v25 = vpop.f32.mrf.mxu3  ;;  %v3347_v36 = vpop.f32.mrf.mxu0 }
 0x236   : > { %v3091_v35 = vadd.f32 %v3003_v25, %v2750_v7 }
 0x237   : > { %v2325_v30 = vpop.f32.mrf.mxu1  ;;  %4161 = vmatmul.msk.f32.gmra.mxu0 %vm298_vm1, %v5159_v11 }
 0x238   : > { %v5500_v15 = vadd.f32 %v3344_v60, %v3091_v35  ;;  %4093 = vmatmul.msk.f32.gmra.mxu2 %vm298_vm1, %v2489_v40  ;;  %v2492_v40 = vld [vmem:[#allocation2 + $0x150] sm:$0xff] }
 0x239   : > { %4127 = vmatmul.msk.f32.gmra.mxu3 %vm298_vm1, %v5127_v45  ;;  %v6011_v45 = vld [vmem:[#allocation46_spill] sm:$0xff] }
 0x23a   : > { %3528 = vst [vmem:[%s5456_s16 + $0x20] sm:$0xff] %v5500_v15  ;;  %4060 = vmatmul.msk.f32.gmra.mxu1 %vm298_vm1, %v5144_v2  ;;  %v2409_v2 = vadd.f32 %v2325_v30, %v6011_v45 }
 0x23b   : > { %v2665_v32 = vpop.f32.mrf.mxu2 }
 0x23c   : > { %v2751_v26 = vadd.f32 %v2665_v32, %v2408_v61  ;;  %v3006_v6 = vpop.f32.mrf.mxu3  ;;  %v3350_v57 = vpop.f32.mrf.mxu0 }
 0x23e   : > { %v3092_v63 = vadd.f32 %v3006_v6, %v2751_v26 }
 0x23f   : > { %v2328_v48 = vpop.f32.mrf.mxu1  ;;  %4162 = vmatmul.msk.f32.gmra.mxu0 %vm298_vm1, %v5176_v14 }
 0x240   : > { %v5512_v38 = vadd.f32 %v3347_v36, %v3092_v63  ;;  %4094 = vmatmul.msk.f32.gmra.mxu2 %vm298_vm1, %v2490_v24 }
 0x241   : > { %4128 = vmatmul.msk.f32.gmra.mxu3 %vm298_vm1, %v5142_v13  ;;  %v6012_v13 = vld [vmem:[#allocation47_spill] sm:$0xff] }
 0x242   : > { %3529 = vst [vmem:[%s5456_s16 + $0x28] sm:$0xff] %v5512_v38  ;;  %4061 = vmatmul.msk.f32.gmra.mxu1 %vm298_vm1, %v5159_v11  ;;  %v2410_v11 = vadd.f32 %v2328_v48, %v6012_v13 }
 0x243   : > { %v2668_v33 = vpop.f32.mrf.mxu2 }
 0x244   : > { %v2752_v9 = vadd.f32 %v2668_v33, %v2409_v2  ;;  %v3009_v60 = vpop.f32.mrf.mxu3  ;;  %v3353_v3 = vpop.f32.mrf.mxu0 }
 0x246   : > { %v3093_v42 = vadd.f32 %v3009_v60, %v2752_v9  ;;  %v2494_v60 = vld [vmem:[#allocation2 + $0x168] sm:$0xff] }
 0x247   : > { %v2331_v46 = vpop.f32.mrf.mxu1  ;;  %4163 = vmatmul.msk.f32.gmra.mxu0 %vm298_vm1, %v5193_v12 }
 0x248   : > { %v5524_v54 = vadd.f32 %v3350_v57, %v3093_v42  ;;  %4095 = vmatmul.msk.f32.gmra.mxu2 %vm298_vm1, %v2491_v17  ;;  %v2493_v57 = vld [vmem:[#allocation2 + $0x158] sm:$0xff] }
 0x249   : > { %4129 = vmatmul.msk.f32.gmra.mxu3 %vm298_vm1, %v5157_v10  ;;  %v6013_v10 = vld [vmem:[#allocation48_spill] sm:$0xff] }
 0x24a   : > { %3530 = vst [vmem:[%s5456_s16 + $0x30] sm:$0xff] %v5524_v54  ;;  %4062 = vmatmul.msk.f32.gmra.mxu1 %vm298_vm1, %v5176_v14  ;;  %v2411_v14 = vadd.f32 %v2331_v46, %v6013_v10 }
 0x24b   : > { %v2671_v22 = vpop.f32.mrf.mxu2 }
 0x24c   : > { %v2753_v7 = vadd.f32 %v2671_v22, %v2410_v11  ;;  %v3012_v25 = vpop.f32.mrf.mxu3  ;;  %v3356_v36 = vpop.f32.mrf.mxu0 }
 0x24e   : > { %v3094_v35 = vadd.f32 %v3012_v25, %v2753_v7  ;;  %v2495_v7 = vld [vmem:[#allocation2 + $0x170] sm:$0xff] }
 0x24f   : > { %v2334_v30 = vpop.f32.mrf.mxu1  ;;  %4164 = vmatmul.msk.f32.gmra.mxu0 %vm298_vm1, %v5208_v41 }
 0x250   : > { %v5536_v56 = vadd.f32 %v3353_v3, %v3094_v35  ;;  %4096 = vmatmul.msk.f32.gmra.mxu2 %vm298_vm1, %v2492_v40  ;;  %v6017_v35 = vld [vmem:[#allocation51_spill] sm:$0xff] }
 0x251   : > { %4130 = vmatmul.msk.f32.gmra.mxu3 %vm298_vm1, %v5174_v34  ;;  %v6014_v34 = vld [vmem:[#allocation49_spill] sm:$0xff] }
 0x252   : > { %3531 = vst [vmem:[%s5456_s16 + $0x38] sm:$0xff] %v5536_v56  ;;  %4063 = vmatmul.msk.f32.gmra.mxu1 %vm298_vm1, %v5193_v12  ;;  %v2412_v12 = vadd.f32 %v2334_v30, %v6014_v34  ;;  %v6020_v34 = vld [vmem:[#allocation53_spill] sm:$0xff] }
 0x253   : > { %v2674_v61 = vpop.f32.mrf.mxu2 }
 0x254   : > { %v2754_v32 = vadd.f32 %v2674_v61, %v2411_v14  ;;  %v3015_v26 = vpop.f32.mrf.mxu3  ;;  %v3359_v6 = vpop.f32.mrf.mxu0 }
 0x256   : > { %v3095_v24 = vadd.f32 %v3015_v26, %v2754_v32  ;;  %v3179_v32 = vld [vmem:[#allocation2 + $0x182] sm:$0xff] }
 0x257   : > { %v2337_v63 = vpop.f32.mrf.mxu1  ;;  %4165 = vmatmul.msk.f32.gmra.mxu0 %vm298_vm1, %v5223_v27 }
 0x258   : > { %v5548_v48 = vadd.f32 %v3356_v36, %v3095_v24  ;;  %4097 = vmatmul.msk.f32.gmra.mxu2 %vm298_vm1, %v2493_v57  ;;  %v6018_v24 = vld [vmem:[#allocation55_spill] sm:$0xff] }
 0x259   : > { %4131 = vmatmul.msk.f32.gmra.mxu3 %vm298_vm1, %v5191_v59  ;;  %v6015_v59 = vld [vmem:[#allocation50_spill] sm:$0xff] }
 0x25a   : > { %3532 = vst [vmem:[%s5456_s16 + $0x40] sm:$0xff] %v5548_v48  ;;  %4064 = vmatmul.msk.f32.gmra.mxu1 %vm298_vm1, %v5208_v41  ;;  %v2413_v41 = vadd.f32 %v2337_v63, %v6015_v59  ;;  %v6019_v63 = vld [vmem:[#allocation54_spill] sm:$0xff]  ;;  %v6021_v59 = vld [vmem:[#allocation56_spill] sm:$0xff] }
 0x25b   : > { %v2677_v45 = vpop.f32.mrf.mxu2 }
 0x25c   : > { %v2755_v2 = vadd.f32 %v2677_v45, %v2412_v12  ;;  %v3018_v33 = vpop.f32.mrf.mxu3  ;;  %v3362_v9 = vpop.f32.mrf.mxu0 }
 0x25e   : > { %v3096_v3 = vadd.f32 %v3018_v33, %v2755_v2 }
 0x25f   : > { %v2340_v17 = vpop.f32.mrf.mxu1  ;;  %4166 = vmatmul.msk.f32.gmra.mxu0 %vm298_vm1, %v5238_v44 }
 0x260   : > { %v5560_v42 = vadd.f32 %v3359_v6, %v3096_v3  ;;  %4098 = vmatmul.msk.f32.gmra.mxu2 %vm298_vm1, %v2494_v60 }
 0x261   : > { %4132 = vmatmul.msk.f32.gmra.mxu3 %vm298_vm1, %v5206_v31  ;;  %v6016_v31 = vld [vmem:[#allocation52_spill] sm:$0xff] }
 0x262   : > { %3533 = vst [vmem:[%s5456_s16 + $0x48] sm:$0xff] %v5560_v42  ;;  %4065 = vmatmul.msk.f32.gmra.mxu1 %vm298_vm1, %v5223_v27  ;;  %v2414_v27 = vadd.f32 %v2340_v17, %v6017_v35 }
 0x263   : > { %v2680_v46 = vpop.f32.mrf.mxu2 }
 0x264   : > { %v2756_v13 = vadd.f32 %v2680_v46, %v2413_v41  ;;  %v3021_v11 = vpop.f32.mrf.mxu3  ;;  %v3365_v22 = vpop.f32.mrf.mxu0 }
 0x266   : > { %v3097_v25 = vadd.f32 %v3021_v11, %v2756_v13 }
 0x267   : > { %v2343_v36 = vpop.f32.mrf.mxu1  ;;  %4167 = vmatmul.msk.f32.gmra.mxu0 %vm298_vm1, %v5255_v5 }
 0x268   : > { %v5572_v40 = vadd.f32 %v3362_v9, %v3097_v25  ;;  %4099 = vmatmul.msk.f32.gmra.mxu2 %vm298_vm1, %v2495_v7  ;;  %v3180_v9 = vld [vmem:[#allocation2 + $0x18a] sm:$0xff]  ;;  %v2498_v7 = vld [vmem:[#allocation2 + $0x198] sm:$0xff] }
 0x269   : > { %4133 = vmatmul.msk.f32.gmra.mxu3 %vm298_vm1, %v6016_v31 }
 0x26a   : > { %3534 = vst [vmem:[%s5456_s16 + $0x50] sm:$0xff] %v5572_v40  ;;  %4066 = vmatmul.msk.f32.gmra.mxu1 %vm298_vm1, %v5238_v44  ;;  %v2415_v44 = vadd.f32 %v2343_v36, %v6020_v34  ;;  %v2840_v36 = vld [vmem:[#allocation2 + $0x199] sm:$0xff] }
 0x26b   : > { %v2683_v30 = vpop.f32.mrf.mxu2 }
 0x26c   : > { %v2757_v10 = vadd.f32 %v2683_v30, %v2414_v27  ;;  %v3024_v14 = vpop.f32.mrf.mxu3  ;;  %v3368_v61 = vpop.f32.mrf.mxu0 }
 0x26e   : > { %v3098_v26 = vadd.f32 %v3024_v14, %v2757_v10  ;;  %v3182_v14 = vld [vmem:[#allocation2 + $0x1a2] sm:$0xff] }
 0x26f   : > { %v2346_v6 = vpop.f32.mrf.mxu1  ;;  %4168 = vmatmul.msk.f32.gmra.mxu0 %vm298_vm1, %v3179_v32 }
 0x270   : > { %v5583_v57 = vadd.f32 %v3365_v22, %v3098_v26  ;;  %4100 = vmatmul.msk.f32.gmra.mxu2 %vm298_vm1, %v6018_v24  ;;  %v2416_v41 = vadd.f32 %v2346_v6, %v6021_v59  ;;  %v3181_v22 = vld [vmem:[#allocation2 + $0x19a] sm:$0xff] }
 0x271   : > { %4134 = vmatmul.msk.f32.gmra.mxu3 %vm298_vm1, %v6019_v63  ;;  %v2841_v26 = vld [vmem:[#allocation2 + $0x1a1] sm:$0xff] }
 0x272   : > { %3535 = vst [vmem:[%s5456_s16 + $0x58] sm:$0xff] %v5583_v57  ;;  %4067 = vmatmul.msk.f32.gmra.mxu1 %vm298_vm1, %v5255_v5 }
 0x273   : > { %v2686_v12 = vpop.f32.mrf.mxu2 }
 0x274   : > { %v2758_v45 = vadd.f32 %v2686_v12, %v2415_v44  ;;  %v3027_v2 = vpop.f32.mrf.mxu3  ;;  %v3371_v33 = vpop.f32.mrf.mxu0 }
 0x276   : > { %v3099_v60 = vadd.f32 %v3027_v2, %v2758_v45 }
 0x277   : > { %v2349_v3 = vpop.f32.mrf.mxu1  ;;  %4169 = vmatmul.msk.f32.gmra.mxu0 %vm298_vm1, %v3180_v9 }
 0x278   : > { %v5595_v17 = vadd.f32 %v3368_v61, %v3099_v60  ;;  %4101 = vmatmul.msk.f32.gmra.mxu2 %vm298_vm1, %v5257_v37  ;;  %v2499_v61 = vld [vmem:[#allocation2 + $0x1a0] sm:$0xff] }
 0x279   : > { %4135 = vmatmul.msk.f32.gmra.mxu3 %vm298_vm1, %v5253_v62  ;;  %v2417_v62 = vadd.f32 %v2349_v3, %v5261_v28 }
 0x27a   : > { %3536 = vst [vmem:[%s5456_s16 + $0x60] sm:$0xff] %v5595_v17  ;;  %4068 = vmatmul.msk.f32.gmra.mxu1 %vm298_vm1, %v3179_v32 }
 0x27b   : > { %v2689_v5 = vpop.f32.mrf.mxu2 }
 0x27c   : > { %v2759_v46 = vadd.f32 %v2689_v5, %v2416_v41  ;;  %v3030_v13 = vpop.f32.mrf.mxu3  ;;  %v3374_v11 = vpop.f32.mrf.mxu0 }
 0x27e   : > { %v3100_v25 = vadd.f32 %v3030_v13, %v2759_v46 }
 0x27f   : > { %v2352_v31 = vpop.f32.mrf.mxu1  ;;  %4170 = vmatmul.msk.f32.gmra.mxu0 %vm298_vm1, %v3181_v22 }
 0x280   : > { %v5606_v37 = vadd.f32 %v3371_v33, %v3100_v25  ;;  %4102 = vmatmul.msk.f32.gmra.mxu2 %vm298_vm1, %v2498_v7  ;;  %v2418_v28 = vadd.f32 %v2352_v31, %v5272_v52 }
 0x281   : > { %4136 = vmatmul.msk.f32.gmra.mxu3 %vm298_vm1, %v2840_v36 }
 0x282   : > { %3537 = vst [vmem:[%s5456_s16 + $0x68] sm:$0xff] %v5606_v37  ;;  %4069 = vmatmul.msk.f32.gmra.mxu1 %vm298_vm1, %v3180_v9 }
 0x283   : > { %v2692_v35 = vpop.f32.mrf.mxu2 }
 0x284   : > { %v2760_v27 = vadd.f32 %v2692_v35, %v2417_v62  ;;  %v3033_v30 = vpop.f32.mrf.mxu3  ;;  %v3377_v10 = vpop.f32.mrf.mxu0 }
 0x286   : > { %v3101_v32 = vadd.f32 %v3033_v30, %v2760_v27 }
 0x287   : > { %v2355_v6 = vpop.f32.mrf.mxu1  ;;  %4171 = vmatmul.msk.f32.gmra.mxu0 %vm298_vm1, %v3182_v14 }
 0x288   : > { %v5615_v24 = vadd.f32 %v3374_v11, %v3101_v32  ;;  %4103 = vmatmul.msk.f32.gmra.mxu2 %vm298_vm1, %v2499_v61  ;;  %v2419_v9 = vadd.f32 %v2355_v6, %v5283_v50 }
 0x289   : > { %4137 = vmatmul.msk.f32.gmra.mxu3 %vm298_vm1, %v2841_v26 }
 0x28a   : > { %3538 = vst [vmem:[%s5456_s16 + $0x70] sm:$0xff] %v5615_v24 }
 0x28b   : > { %v2695_v63 = vpop.f32.mrf.mxu2 }
 0x28c   : > { %v2761_v34 = vadd.f32 %v2695_v63, %v2418_v28  ;;  %v3036_v44 = vpop.f32.mrf.mxu3  ;;  %v3380_v12 = vpop.f32.mrf.mxu0 }
 0x28e   : > { %v3102_v45 = vadd.f32 %v3036_v44, %v2761_v34 }
 0x28f   : > { %v2358_v2 = vpop.f32.mrf.mxu1 }
 0x290   : > { %v5622_v33 = vadd.f32 %v3377_v10, %v3102_v45  ;;  %v2420_v13 = vadd.f32 %v2358_v2, %v5294_v4 }
 0x292   : > { %3539 = vst [vmem:[%s5456_s16 + $0x78] sm:$0xff] %v5622_v33 }
 0x293   : > { %v2698_v60 = vpop.f32.mrf.mxu2 }
 0x294   : > { %v2762_v3 = vadd.f32 %v2698_v60, %v2419_v9  ;;  %v3039_v59 = vpop.f32.mrf.mxu3  ;;  %v3383_v52 = vpop.f32.mrf.mxu0 }
 0x296   : > { %v3103_v41 = vadd.f32 %v3039_v59, %v2762_v3 }
 0x297   : > { %v2361_v5 = vpop.f32.mrf.mxu1 }
 0x298   : > { %v5627_v46 = vadd.f32 %v3380_v12, %v3103_v41  ;;  %v2421_v62 = vadd.f32 %v2361_v5, %v5305_v55 }
 0x29a   : > { %3540 = vst [vmem:[%s5456_s16 + $0x80] sm:$0xff] %v5627_v46 }
 0x29b   : > { %v2701_v11 = vpop.f32.mrf.mxu2 }
 0x29c   : > { %v2763_v22 = vadd.f32 %v2701_v11, %v2420_v13  ;;  %v3042_v7 = vpop.f32.mrf.mxu3  ;;  %v3386_v50 = vpop.f32.mrf.mxu0 }
 0x29e   : > { %v3104_v25 = vadd.f32 %v3042_v7, %v2763_v22 }
 0x29f   : > { %v2364_v36 = vpop.f32.mrf.mxu1 }
 0x2a0   : > { %v5632_v31 = vadd.f32 %v3383_v52, %v3104_v25  ;;  %v2422_v32 = vadd.f32 %v2364_v36, %v5316_v53 }
 0x2a2   : > { %3541 = vst [vmem:[%s5456_s16 + $0x88] sm:$0xff] %v5632_v31 }
 0x2a3   : > { %v2704_v35 = vpop.f32.mrf.mxu2 }
 0x2a4   : > { %v2764_v27 = vadd.f32 %v2704_v35, %v2421_v62  ;;  %v3045_v30 = vpop.f32.mrf.mxu3  ;;  %v3389_v4 = vpop.f32.mrf.mxu0 }
 0x2a6   : > { %v3105_v10 = vadd.f32 %v3045_v30, %v2764_v27 }
 0x2a7   : > { %v2367_v14 = vpop.f32.mrf.mxu1 }
 0x2a8   : > { %v5637_v61 = vadd.f32 %v3386_v50, %v3105_v10  ;;  %v2423_v12 = vadd.f32 %v2367_v14, %v5326_v20  ;;  %v3556_v20 = vadd.f32 %v5464_v49, %v5450_v16 }
 0x2aa   : > { %3542 = vst [vmem:[%s5456_s16 + $0x90] sm:$0xff] %v5637_v61  ;;  %v3557_v50 = vadd.f32 %v3556_v20, %v5476_v8 }
 0x2ab   : > { %v2707_v26 = vpop.f32.mrf.mxu2 }
 0x2ac   : > { %v2765_v6 = vadd.f32 %v2707_v26, %v2422_v32  ;;  %v3048_v28 = vpop.f32.mrf.mxu3  ;;  %v3392_v55 = vpop.f32.mrf.mxu0  ;;  %v3558_v36 = vadd.f32 %v3557_v50, %v5488_v43 }
 0x2ae   : > { %v3106_v63 = vadd.f32 %v3048_v28, %v2765_v6  ;;  %v3559_v35 = vadd.f32 %v3558_v36, %v5500_v15 }
 0x2af   : > { %v2370_v34 = vpop.f32.mrf.mxu1 }
 0x2b0   : > { %v5642_v44 = vadd.f32 %v3389_v4, %v3106_v63  ;;  %v2424_v52 = vadd.f32 %v2370_v34, %v5336_v58  ;;  %v3560_v10 = vadd.f32 %v3559_v35, %v5512_v38 }
 0x2b2   : > { %3543 = vst [vmem:[%s5456_s16 + $0x98] sm:$0xff] %v5642_v44  ;;  %v3561_v26 = vadd.f32 %v3560_v10, %v5524_v54 }
 0x2b3   : > { %v2710_v45 = vpop.f32.mrf.mxu2 }
 0x2b4   : > { %v2766_v2 = vadd.f32 %v2710_v45, %v2423_v12  ;;  %v3051_v9 = vpop.f32.mrf.mxu3  ;;  %v3395_v60 = vpop.f32.mrf.mxu0  ;;  %v3562_v28 = vadd.f32 %v3561_v26, %v5536_v56 }
 0x2b6   : > { %v3107_v53 = vadd.f32 %v3051_v9, %v2766_v2  ;;  %v3563_v63 = vadd.f32 %v3562_v28, %v5548_v48 }
 0x2b7   : > { %v2373_v3 = vpop.f32.mrf.mxu1 }
 0x2b8   : > { %v5647_v59 = vadd.f32 %v3392_v55, %v3107_v53  ;;  %v2425_v58 = vadd.f32 %v2373_v3, %v5346_v39  ;;  %v3564_v2 = vadd.f32 %v3563_v63, %v5560_v42 }
 0x2ba   : > { %3544 = vst [vmem:[%s5456_s16 + $0xa0] sm:$0xff] %v5647_v59  ;;  %v3565_v53 = vadd.f32 %v3564_v2, %v5572_v40 }
 0x2bb   : > { %v2713_v41 = vpop.f32.mrf.mxu2 }
 0x2bc   : > { %v2767_v5 = vadd.f32 %v2713_v41, %v2424_v52  ;;  %v3054_v13 = vpop.f32.mrf.mxu3  ;;  %v3398_v11 = vpop.f32.mrf.mxu0  ;;  %v3566_v52 = vadd.f32 %v3565_v53, %v5583_v57 }
 0x2be   : > { %v3108_v22 = vadd.f32 %v3054_v13, %v2767_v5  ;;  %v3567_v5 = vadd.f32 %v3566_v52, %v5595_v17 }
 0x2bf   : > { %v2376_v7 = vpop.f32.mrf.mxu1 }
 0x2c0   : > { %v5655_v25 = vadd.f32 %v3395_v60, %v3108_v22  ;;  %v2426_v39 = vadd.f32 %v2376_v7, %v5356_v1  ;;  %v3568_v22 = vadd.f32 %v3567_v5, %v5606_v37 }
 0x2c2   : > { %3545 = vst [vmem:[%s5456_s16 + $0xa8] sm:$0xff] %v5655_v25  ;;  %v3569_v36 = vadd.f32 %v3568_v22, %v5615_v24 }
 0x2c3   : > { %v2716_v62 = vpop.f32.mrf.mxu2 }
 0x2c4   : > { %v2768_v27 = vadd.f32 %v2716_v62, %v2425_v58  ;;  %v3057_v30 = vpop.f32.mrf.mxu3  ;;  %v3401_v4 = vpop.f32.mrf.mxu0  ;;  %v3570_v62 = vadd.f32 %v3569_v36, %v5622_v33 }
 0x2c6   : > { %v3109_v14 = vadd.f32 %v3057_v30, %v2768_v27  ;;  %v3571_v27 = vadd.f32 %v3570_v62, %v5627_v46 }
 0x2c7   : > { %v2379_v32 = vpop.f32.mrf.mxu1 }
 0x2c8   : > { %v5664_v6 = vadd.f32 %v3398_v11, %v3109_v14  ;;  %v2427_v1 = vadd.f32 %v2379_v32, %v5366_v29  ;;  %v3572_v14 = vadd.f32 %v3571_v27, %v5632_v31 }
 0x2ca   : > { %3546 = vst [vmem:[%s5456_s16 + $0xb0] sm:$0xff] %v5664_v6  ;;  %v3573_v28 = vadd.f32 %v3572_v14, %v5637_v61 }
 0x2cb   : > { %v2719_v55 = vpop.f32.mrf.mxu2 }
 0x2cc   : > { %v2769_v34 = vadd.f32 %v2719_v55, %v2426_v39  ;;  %v3060_v12 = vpop.f32.mrf.mxu3  ;;  %v3404_v45 = vpop.f32.mrf.mxu0  ;;  %v3574_v55 = vadd.f32 %v3573_v28, %v5642_v44 }
 0x2ce   : > { %v3110_v9 = vadd.f32 %v3060_v12, %v2769_v34  ;;  %v3575_v34 = vadd.f32 %v3574_v55, %v5647_v59 }
 0x2cf   : > { %v2382_v60 = vpop.f32.mrf.mxu1 }
 0x2d0   : > { %v5673_v3 = vadd.f32 %v3401_v4, %v3110_v9  ;;  %v2428_v29 = vadd.f32 %v2382_v60, %v5376_v0  ;;  %v3576_v9 = vadd.f32 %v3575_v34, %v5655_v25 }
 0x2d2   : > { %3547 = vst [vmem:[%s5456_s16 + $0xb8] sm:$0xff] %v5673_v3  ;;  %v3577_v53 = vadd.f32 %v3576_v9, %v5664_v6 }
 0x2d3   : > { %v2722_v41 = vpop.f32.mrf.mxu2 }
 0x2d4   : > { %v2770_v13 = vadd.f32 %v2722_v41, %v2427_v1  ;;  %v3063_v11 = vpop.f32.mrf.mxu3  ;;  %v3407_v20 = vpop.f32.mrf.mxu0  ;;  %v3578_v41 = vadd.f32 %v3577_v53, %v5673_v3 }
 0x2d6   : > { %v3111_v7 = vadd.f32 %v3063_v11, %v2770_v13 }
 0x2d7   : > { %v2385_v50 = vpop.f32.mrf.mxu1 }
 0x2d8   : > { %v5682_v58 = vadd.f32 %v3404_v45, %v3111_v7  ;;  %v2429_v0 = vadd.f32 %v2385_v50, %v5386_v51 }
 0x2da   : > { %3548 = vst [vmem:[%s5456_s16 + $0xc0] sm:$0xff] %v5682_v58  ;;  %v3579_v13 = vadd.f32 %v3578_v41, %v5682_v58 }
 0x2db   : > { %v2725_v35 = vpop.f32.mrf.mxu2 }
 0x2dc   : > { %v2771_v30 = vadd.f32 %v2725_v35, %v2428_v29  ;;  %v3066_v4 = vpop.f32.mrf.mxu3  ;;  %v3410_v10 = vpop.f32.mrf.mxu0 }
 0x2de   : > { %v3112_v32 = vadd.f32 %v3066_v4, %v2771_v30 }
 0x2df   : > { %v2388_v26 = vpop.f32.mrf.mxu1 }
 0x2e0   : > { %v5691_v39 = vadd.f32 %v3407_v20, %v3112_v32  ;;  %v2430_v51 = vadd.f32 %v2388_v26, %v5396_v19 }
 0x2e2   : > { %3549 = vst [vmem:[%s5456_s16 + $0xc8] sm:$0xff] %v5691_v39  ;;  %v3580_v22 = vadd.f32 %v3579_v13, %v5691_v39 }
 0x2e3   : > { %v2728_v63 = vpop.f32.mrf.mxu2 }
 0x2e4   : > { %v2772_v12 = vadd.f32 %v2728_v63, %v2429_v0  ;;  %v3069_v45 = vpop.f32.mrf.mxu3  ;;  %v3413_v2 = vpop.f32.mrf.mxu0 }
 0x2e6   : > { %v3113_v60 = vadd.f32 %v3069_v45, %v2772_v12 }
 0x2e7   : > { %v2391_v1 = vpop.f32.mrf.mxu1 }
 0x2e8   : > { %v5700_v52 = vadd.f32 %v3410_v10, %v3113_v60  ;;  %v2431_v29 = vadd.f32 %v2391_v1, %v5406_v21 }
 0x2ea   : > { %3550 = vst [vmem:[%s5456_s16 + $0xd0] sm:$0xff] %v5700_v52  ;;  %v3581_v36 = vadd.f32 %v3580_v22, %v5700_v52 }
 0x2eb   : > { %v2731_v5 = vpop.f32.mrf.mxu2 }
 0x2ec   : > { %v2773_v11 = vadd.f32 %v2731_v5, %v2430_v51  ;;  %v3072_v20 = vpop.f32.mrf.mxu3  ;;  %v3416_v50 = vpop.f32.mrf.mxu0 }
 0x2ee   : > { %v3114_v7 = vadd.f32 %v3072_v20, %v2773_v11 }
 0x2ef   : > { %v2394_v27 = vpop.f32.mrf.mxu1 }
 0x2f0   : > { %v5709_v62 = vadd.f32 %v3413_v2, %v3114_v7  ;;  %v2432_v26 = vadd.f32 %v2394_v27, %v5416_v47 }
 0x2f2   : > { %3551 = vst [vmem:[%s5456_s16 + $0xd8] sm:$0xff] %v5709_v62  ;;  %v3582_v19 = vadd.f32 %v3581_v36, %v5709_v62 }
 0x2f3   : > { %v2734_v35 = vpop.f32.mrf.mxu2 }
 0x2f4   : > { %v2774_v30 = vadd.f32 %v2734_v35, %v2431_v29  ;;  %v3075_v4 = vpop.f32.mrf.mxu3  ;;  %v3419_v32 = vpop.f32.mrf.mxu0 }
 0x2f6   : > { %v3115_v10 = vadd.f32 %v3075_v4, %v2774_v30 }
 0x2f7   : > { %v2397_v63 = vpop.f32.mrf.mxu1 }
 0x2f8   : > { %v5715_v14 = vadd.f32 %v3416_v50, %v3115_v10  ;;  %v2433_v45 = vadd.f32 %v2397_v63, %v5426_v23 }
 0x2fa   : > { %3552 = vst [vmem:[%s5456_s16 + $0xe0] sm:$0xff] %v5715_v14  ;;  %v3583_v28 = vadd.f32 %v3582_v19, %v5715_v14 }
 0x2fb   : > { %v2737_v21 = vpop.f32.mrf.mxu2 }
 0x2fc   : > { %v2775_v55 = vadd.f32 %v2737_v21, %v2432_v26  ;;  %v3078_v0 = vpop.f32.mrf.mxu3  ;;  %v3422_v9 = vpop.f32.mrf.mxu0 }
 0x2fe   : > { %v3116_v34 = vadd.f32 %v3078_v0, %v2775_v55 }
 0x2ff   : > { %v2400_v41 = vpop.f32.mrf.mxu1 }
 0x300   : > { %v5721_v12 = vadd.f32 %v3419_v32, %v3116_v34  ;;  %v2434_v5 = vadd.f32 %v2400_v41, %v5436_v18 }
 0x302   : > { %3553 = vst [vmem:[%s5456_s16 + $0xe8] sm:$0xff] %v5721_v12  ;;  %v3584_v2 = vadd.f32 %v3583_v28, %v5721_v12 }
 0x303   : > { %v2740_v47 = vpop.f32.mrf.mxu2 }
 0x304   : > { %v2776_v60 = vadd.f32 %v2740_v47, %v2433_v45  ;;  %v3081_v53 = vpop.f32.mrf.mxu3  ;;  %v3425_v22 = vpop.f32.mrf.mxu0 }
 0x306   : > { %v3117_v1 = vadd.f32 %v3081_v53, %v2776_v60 }
 0x308   : > { %v5728_v51 = vadd.f32 %v3422_v9, %v3117_v1 }
 0x30a   : > { %3554 = vst [vmem:[%s5456_s16 + $0xf0] sm:$0xff] %v5728_v51  ;;  %v3585_v23 = vadd.f32 %v3584_v2, %v5728_v51 }
 0x30b   : > { %v2743_v13 = vpop.f32.mrf.mxu2 }
 0x30c   : > { %v2777_v11 = vadd.f32 %v2743_v13, %v2434_v5  ;;  %v3084_v20 = vpop.f32.mrf.mxu3 }
 0x30e   : > { %v3118_v7 = vadd.f32 %v3084_v20, %v2777_v11 }
 0x310   : > { %v3459_v50 = vadd.f32 %v3425_v22, %v3118_v7 }
 0x312   : > { %3555 = vst [vmem:[%s5456_s16 + $0xf8] sm:$0xff] %v3459_v50  ;;  %v3586_v18 = vadd.f32 %v3585_v23, %v3459_v50 }
 0x313   : > { %4261 = shalt.err (!%p4258_p3)
}
 0x314   : > { %s4359_s16 = smov 128   ;;  %s4360_s17 = smov 8   ;;  %v3587_v36 = vrot.slane %v3586_v18, 4 }
 0x315   : > { %4182 = dma.vmem_to_hbm [thread:$0]  (%p4436_p5), %s3719_s26, 4096, %s3721_s27, %s3698_s7, %s4359_s16, %s4359_s16, %s4360_s17  }
 0x316   : > { %v3588_v29 = vadd.f32 %v3587_v36, %v3586_v18  ;;  %s3732_s20 = scalar_lea.hbm %s5898_s5, %s4417_s23  ;;  %s3702_s8 = sand.u32 1, %s4417_s23  }
 0x317   : > { %s254_s9 = scalar_lea.vmem [#allocation6], %s5442_s13  ;;  %s3736_s11 = sshll.u32 %s3732_s20, 4  ;;  %s3737_s11 = int_to_ptr.hbm [resolvable:$true] %s3736_s11 }
 0x318   : > { %v3589_v19 = vrot.slane %v3588_v29, 2  ;;  %s3734_s10 = sshll.u32 %s254_s9, 4  ;;  %s5756_s12 = scalar_lea.sflag [#allocation7], %s3702_s8  ;;  %s3735_s10 = int_to_ptr.vmem [resolvable:$true] %s3734_s10 }
 0x319   : > { %s4276_s26 = sshra.s32 %s3737_s11, 4  ;;  %s4282_s15 = scalar_lea.hbm %s5898_s5, 2  ;;  %s4277_s26 = int_to_ptr.hbm [resolvable:$true] %s4276_s26 }
 0x31a   : > { %v3590_v35 = vadd.f32 %v3589_v19, %v3588_v29  ;;  %s4278_s27 = scalar_lea.hbm %s4277_s26, 1  ;;  %p4283_p9 = scmp.lt.s32.totalorder %s4277_s26, %s5898_s5 }
 0x31b   : > { %p4279_p4 = scmp.ne.s32.totalorder %s4277_s26, %s4278_s27  ;;  %p4284_p10 = scmp.lt.s32.totalorder %s4282_s15, %s4278_s27 }
 0x31c   : > { %v3591_v27 = vrot.slane %v3590_v35, 1 }
 0x31d   : > { %p4280_p7 = pnand %p4279_p4, %p4436_p5  ;;  %p4285_p11 = por %p4284_p10, %p4283_p9 }
 0x31e   : > { %v3592_v30 = vadd.f32 %v3591_v27, %v3590_v35 }
 0x31f   : > { %p4281_p8 = pneg %p4280_p7 }
 0x320   : > { %3626 = vst [vmem:[%s254_s9] sm:$0x1] %v3592_v30 }
 0x321   : > { %p4286_p12 = pnand %p4285_p11, %p4281_p8 }
 0x323   : > { %4289 = shalt.err (!%p4286_p12)
}
 0x324   : > { %4183 = dma.vmem_to_hbm [thread:$0]  (%p4436_p5), %s3735_s10, 16, %s3737_s11, %s5756_s12   ;;  %v5769_v4 = vmul.f32 0.00390625, %v3592_v30 }
 0x325   : > { %s3745_s20 = scalar_lea.hbm %s5899_s6, %s4417_s23  ;;  %s260_s8 = scalar_lea.vmem [#allocation8], %s5442_s13 }
 0x326   : > { %v5773_v10 = vsub.f32 %v5700_v52, %v5769_v4  ;;  %v5777_v32 = vsub.f32 %v5709_v62, %v5769_v4  ;;  %v5781_v26 = vsub.f32 %v5715_v14, %v5769_v4  ;;  %v5785_v28 = vsub.f32 %v5721_v12, %v5769_v4  ;;  %s3747_s9 = sshll.u32 %s260_s8, 4  ;;  %s3749_s10 = sshll.u32 %s3745_s20, 4  ;;  %s3748_s9 = int_to_ptr.vmem [resolvable:$true] %s3747_s9  ;;  %s3750_s10 = int_to_ptr.hbm [resolvable:$true] %s3749_s10 }
 0x327   : > { %v5789_v21 = vsub.f32 %v5728_v51, %v5769_v4  ;;  %v5792_v55 = vsub.f32 %v3459_v50, %v5769_v4  ;;  %v3594_v52 = vsub.f32 %v5450_v16, %v5769_v4  ;;  %v3595_v62 = vsub.f32 %v5464_v49, %v5769_v4  ;;  %s4304_s11 = sshra.s32 %s3750_s10, 4  ;;  %s4310_s23 = scalar_lea.hbm %s5899_s6, 2  ;;  %s4305_s11 = int_to_ptr.hbm [resolvable:$true] %s4304_s11 }
 0x328   : > { %v3596_v14 = vsub.f32 %v5476_v8, %v5769_v4  ;;  %v3597_v34 = vsub.f32 %v5488_v43, %v5769_v4  ;;  %v3598_v12 = vsub.f32 %v5500_v15, %v5769_v4  ;;  %v3599_v47 = vsub.f32 %v5512_v38, %v5769_v4  ;;  %s4306_s26 = scalar_lea.hbm %s4305_s11, 1  ;;  %p4311_p2 = scmp.lt.s32.totalorder %s4305_s11, %s5899_s6 }
 0x329   : > { %v3627_v0 = vmul.f32 %v3594_v52, %v3594_v52  ;;  %v3628_v63 = vmul.f32 %v3595_v62, %v3595_v62  ;;  %v3600_v49 = vsub.f32 %v5524_v54, %v5769_v4  ;;  %v3601_v53 = vsub.f32 %v5536_v56, %v5769_v4  ;;  %p4307_p13 = scmp.ne.s32.totalorder %s4305_s11, %s4306_s26  ;;  %p4312_p3 = scmp.lt.s32.totalorder %s4310_s23, %s4306_s26 }
 0x32a   : > { %v3629_v45 = vmul.f32 %v3596_v14, %v3596_v14  ;;  %v3630_v16 = vmul.f32 %v3597_v34, %v3597_v34  ;;  %v3631_v60 = vmul.f32 %v3598_v12, %v3598_v12  ;;  %v3632_v1 = vmul.f32 %v3599_v47, %v3599_v47 }
 0x32b   : > { %v3659_v2 = vadd.f32 %v3628_v63, %v3627_v0  ;;  %v3602_v15 = vsub.f32 %v5548_v48, %v5769_v4  ;;  %v3633_v41 = vmul.f32 %v3600_v49, %v3600_v49  ;;  %v3603_v38 = vsub.f32 %v5560_v42, %v5769_v4  ;;  %p4308_p0 = pnand %p4307_p13, %p4436_p5  ;;  %p4313_p4 = por %p4312_p3, %p4311_p2 }
 0x32c   : > { %v3634_v5 = vmul.f32 %v3601_v53, %v3601_v53  ;;  %v3604_v54 = vsub.f32 %v5572_v40, %v5769_v4  ;;  %v3605_v56 = vsub.f32 %v5583_v57, %v5769_v4  ;;  %v3606_v48 = vsub.f32 %v5595_v17, %v5769_v4 }
 0x32d   : > { %v3660_v9 = vadd.f32 %v3659_v2, %v3629_v45  ;;  %v3635_v13 = vmul.f32 %v3602_v15, %v3602_v15  ;;  %v3636_v20 = vmul.f32 %v3603_v38, %v3603_v38  ;;  %v3607_v42 = vsub.f32 %v5606_v37, %v5769_v4  ;;  %p4309_p1 = pneg %p4308_p0 }
 0x32e   : > { %v3637_v7 = vmul.f32 %v3604_v54, %v3604_v54  ;;  %v3638_v18 = vmul.f32 %v3605_v56, %v3605_v56  ;;  %v3608_v40 = vsub.f32 %v5615_v24, %v5769_v4  ;;  %v3639_v29 = vmul.f32 %v3606_v48, %v3606_v48 }
 0x32f   : > { %v3661_v8 = vadd.f32 %v3660_v9, %v3630_v16  ;;  %v3609_v57 = vsub.f32 %v5622_v33, %v5769_v4  ;;  %v3640_v35 = vmul.f32 %v3607_v42, %v3607_v42  ;;  %v3610_v17 = vsub.f32 %v5627_v46, %v5769_v4  ;;  %p4314_p7 = pnand %p4313_p4, %p4309_p1 }
 0x330   : > { %v3641_v30 = vmul.f32 %v3608_v40, %v3608_v40  ;;  %v3611_v37 = vsub.f32 %v5632_v31, %v5769_v4  ;;  %v3612_v24 = vsub.f32 %v5637_v61, %v5769_v4  ;;  %v3613_v33 = vsub.f32 %v5642_v44, %v5769_v4 }
 0x331   : > { %v3662_v43 = vadd.f32 %v3661_v8, %v3631_v60  ;;  %v3642_v62 = vmul.f32 %v3609_v57, %v3609_v57  ;;  %v3643_v0 = vmul.f32 %v3610_v17, %v3610_v17  ;;  %v3614_v46 = vsub.f32 %v5647_v59, %v5769_v4 }
 0x332   : > { %v3644_v34 = vmul.f32 %v3611_v37, %v3611_v37  ;;  %v3645_v45 = vmul.f32 %v3612_v24, %v3612_v24  ;;  %v3615_v31 = vsub.f32 %v5655_v25, %v5769_v4  ;;  %v3646_v47 = vmul.f32 %v3613_v33, %v3613_v33 }
 0x333   : > { %v3663_v51 = vadd.f32 %v3662_v43, %v3632_v1  ;;  %v3616_v61 = vsub.f32 %v5664_v6, %v5769_v4  ;;  %v3647_v9 = vmul.f32 %v3614_v46, %v3614_v46  ;;  %v3617_v44 = vsub.f32 %v5673_v3, %v5769_v4 }
 0x334   : > { %v3648_v60 = vmul.f32 %v3615_v31, %v3615_v31  ;;  %v3618_v59 = vsub.f32 %v5682_v58, %v5769_v4  ;;  %v3619_v25 = vsub.f32 %v5691_v39, %v5769_v4  ;;  %v3655_v54 = vmul.f32 %v5781_v26, %v5781_v26 }
 0x335   : > { %v3664_v23 = vadd.f32 %v3663_v51, %v3633_v41  ;;  %v3649_v53 = vmul.f32 %v3616_v61, %v3616_v61  ;;  %v3650_v43 = vmul.f32 %v3617_v44, %v3617_v44  ;;  %v3656_v4 = vmul.f32 %v5785_v28, %v5785_v28 }
 0x336   : > { %v3651_v41 = vmul.f32 %v3618_v59, %v3618_v59  ;;  %v3652_v6 = vmul.f32 %v3619_v25, %v3619_v25 }
 0x337   : > { %v3665_v11 = vadd.f32 %v3664_v23, %v3634_v5  ;;  %v3653_v5 = vmul.f32 %v5773_v10, %v5773_v10  ;;  %v3654_v23 = vmul.f32 %v5777_v32, %v5777_v32  ;;  %v3658_v10 = vmul.f32 %v5792_v55, %v5792_v55 }
 0x339   : > { %v3666_v22 = vadd.f32 %v3665_v11, %v3635_v13  ;;  %v3657_v11 = vmul.f32 %v5789_v21, %v5789_v21 }
 0x33b   : > { %v3667_v50 = vadd.f32 %v3666_v22, %v3636_v20 }
 0x33d   : > { %v3668_v36 = vadd.f32 %v3667_v50, %v3637_v7 }
 0x33f   : > { %v3669_v19 = vadd.f32 %v3668_v36, %v3638_v18 }
 0x341   : > { %v3670_v27 = vadd.f32 %v3669_v19, %v3639_v29 }
 0x343   : > { %v3671_v52 = vadd.f32 %v3670_v27, %v3640_v35 }
 0x345   : > { %v3672_v14 = vadd.f32 %v3671_v52, %v3641_v30 }
 0x347   : > { %v3673_v63 = vadd.f32 %v3672_v14, %v3642_v62 }
 0x349   : > { %v3674_v12 = vadd.f32 %v3673_v63, %v3643_v0 }
 0x34b   : > { %v3675_v2 = vadd.f32 %v3674_v12, %v3644_v34 }
 0x34d   : > { %v3676_v16 = vadd.f32 %v3675_v2, %v3645_v45 }
 0x34f   : > { %v3677_v49 = vadd.f32 %v3676_v16, %v3646_v47 }
 0x351   : > { %v3678_v8 = vadd.f32 %v3677_v49, %v3647_v9 }
 0x353   : > { %v3679_v1 = vadd.f32 %v3678_v8, %v3648_v60 }
 0x355   : > { %v3680_v15 = vadd.f32 %v3679_v1, %v3649_v53 }
 0x357   : > { %v3681_v51 = vadd.f32 %v3680_v15, %v3650_v43 }
 0x359   : > { %v3682_v38 = vadd.f32 %v3681_v51, %v3651_v41 }
 0x35b   : > { %v3683_v3 = vadd.f32 %v3682_v38, %v3652_v6 }
 0x35d   : > { %v3684_v58 = vadd.f32 %v3683_v3, %v3653_v5 }
 0x35f   : > { %v3685_v39 = vadd.f32 %v3684_v58, %v3654_v23 }
 0x361   : > { %v3686_v13 = vadd.f32 %v3685_v39, %v3655_v54 }
 0x363   : > { %v3687_v56 = vadd.f32 %v3686_v13, %v3656_v4 }
 0x365   : > { %v3688_v20 = vadd.f32 %v3687_v56, %v3657_v11 }
 0x367   : > { %v3689_v22 = vadd.f32 %v3688_v20, %v3658_v10 }
 0x369   : > { %v3690_v32 = vrot.slane %v3689_v22, 4 }
 0x36b   : > { %v3691_v48 = vadd.f32 %v3690_v32, %v3689_v22 }
 0x36d   : > { %v3692_v7 = vrot.slane %v3691_v48, 2 }
 0x36f   : > { %v3693_v26 = vadd.f32 %v3692_v7, %v3691_v48 }
 0x371   : > { %v3694_v28 = vrot.slane %v3693_v26, 1 }
 0x373   : > { %v3695_v21 = vadd.f32 %v3694_v28, %v3693_v26 }
 0x375   : > { %3696 = vst [vmem:[%s260_s8] sm:$0x1] %v3695_v21 }
 0x376   : > { %4317 = shalt.err (!%p4314_p7)
}
 0x377   : > { %4184 = dma.vmem_to_hbm [thread:$0]  (%p4436_p5), %s3748_s9, 16, %s3750_s10, %s5756_s12  }
 0x378 PF: > { %p4198_p8 = scmp.ge.s32.totalorder %s4356_s3, 2  ;;  %s3761_s15 = sand.u32 1, %s4344_s21  }
 0x379   : > { %s3762_s16 = scalar_lea.sflag [#allocation5], %s3761_s15 }
 0x37a   : > { %p4189_p9 = pnand %p4198_p8, %p4440_p6 }
 0x37c   : > { %p4190_p10 = pneg %p4189_p9 }
 0x37e   : > { %4335 = dma.done.wait (%p4190_p10), %s3762_s16, 4096  }
 0x37f   : > { %4337 = vsyncadd (%p4190_p10), %s3762_s16, 4294963200  ;;  %s3771_s17 = sand.u32 1, %s3862_s24  }
 0x380   : > { %s3772_s18 = scalar_lea.sflag [#allocation7], %s3771_s17 }
 0x381   : > { %4339 = dma.done.wait (%p4190_p10), %s3772_s18, 32  }
 0x382   : > { %4341 = vsyncadd (%p4190_p10), %s3772_s18, 4294967264  ;;  %p20_p5 = scmp.ge.s32.totalorder %s4421_s25, 4   ;;  %s6022_s21 = smov %s4348_s22 }
 0x383   : > { %s6023_s22 = smov %s4352_s2  ;;  %s6024_s2 = smov %s4434_s28 }
 0x384   : > { %s6025_s3 = smov %s4421_s25  ;;  %22 = sbr.rel (!%p20_p5) target bundleno = 5 (0x5), region = 107 }
 0x389   :  { %3786 = vsyncpa [#allocation5], 1 }
 0x38a   :  { %3788 = vsyncpa [#allocation5 + $0x1], 1 }
 0x38b   :  { %3789 = vsyncpa [#allocation7], 1 }
 0x38c   :  { %3791 = vsyncpa [#allocation7 + $0x1], 1 }

</bundles_post_ra>
